<compile_context>
chip_gen: v5e
topology: v5e:2x2
jax: 0.10.0
libtpu: 0.0.40
codegen_flags: <defaults>
</compile_context>

<pallas_src>
import jax
import jax.numpy as jnp
from jax import lax
from jax.experimental import pallas as pl
from jax.experimental.pallas import tpu as pltpu

EPS = 1e-5            # nn.InstanceNorm3d default eps
MAX_FLAT_TILE = 2048  # lanes per streamed flat tile (multiple of 128)


# ---------------------------------------------------------------------------
# Pallas kernel: one (sample n, flat-tile t) grid step.
# ---------------------------------------------------------------------------
def _deconv_block_kernel(p_ref, w_ref, o_ref, acc_ref, s1_ref, s2_ref):
    # p_ref  : (K, TF)        bf16 im2col patches of this flat tile (K=27*Cin)
    # w_ref  : (Cout, K)      bf16 spectrally-normalized conv weight
    # o_ref  : (Cout, FLAT)   f32 output block, resident across the t axis
    # acc_ref: (FT, Cout, TF) f32 conv results for all flat tiles of sample n
    # s1_ref : (Cout, 1)      f32 running per-channel sum
    # s2_ref : (Cout, 1)      f32 running per-channel sum of squares
    t = pl.program_id(1)
    n_t = pl.num_programs(1)
    ft, _, tile_f = acc_ref.shape
    flat = o_ref.shape[-1]

    @pl.when(t == 0)
    def _init():
        s1_ref[...] = jnp.zeros_like(s1_ref)
        s2_ref[...] = jnp.zeros_like(s2_ref)

    # Single fused im2col matmul on the MXU: bf16 in, f32 accumulation.
    # (Conv bias omitted: it is exactly cancelled by InstanceNorm's mean.)
    conv = jnp.dot(w_ref[...], p_ref[...],
                   preferred_element_type=jnp.float32)          # (Cout, TF)

    acc_ref[t] = conv                                   # dynamic leading index
    s1_ref[...] += jnp.sum(conv, axis=1, keepdims=True)
    s2_ref[...] += jnp.sum(conv * conv, axis=1, keepdims=True)

    @pl.when(t == n_t - 1)
    def _finalize():
        inv_n = 1.0 / float(flat)
        mean = s1_ref[...] * inv_n                               # (Cout, 1)
        var = jnp.maximum(s2_ref[...] * inv_n - mean * mean, 0.0)
        scale = lax.rsqrt(var + EPS)
        for ts in range(ft):          # static unroll: lane-dense static stores
            y = (acc_ref[ts] - mean) * scale
            o_ref[:, ts * tile_f:(ts + 1) * tile_f] = jnp.maximum(y, 0.0)


# ---------------------------------------------------------------------------
# JAX glue
# ---------------------------------------------------------------------------
def _upsample_linear_axis(x, axis, scale=2):
    """PyTorch trilinear (separable linear) upsample along one axis,
    align_corners=False."""
    in_size = x.shape[axis]
    out_size = in_size * scale
    o = jnp.arange(out_size, dtype=jnp.float32)
    src = (o + 0.5) / scale - 0.5
    src = jnp.clip(src, 0.0, None)              # PyTorch clamps negatives to 0
    i0 = jnp.clip(jnp.floor(src).astype(jnp.int32), 0, in_size - 1)
    i1 = jnp.minimum(i0 + 1, in_size - 1)
    w1 = src - i0.astype(jnp.float32)
    x0 = jnp.take(x, i0, axis=axis)
    x1 = jnp.take(x, i1, axis=axis)
    shape = [1] * x.ndim
    shape[axis] = out_size
    w1 = w1.reshape(shape)
    return x0 * (1.0 - w1) + x1 * w1


def _spectral_normalize(weight_ocdhw, n_iter=12):
    """Divide the conv weight by an estimate of its largest singular value.

    PyTorch's spectral_norm keeps a persistent random `u` and does one power
    iteration per forward; that stateful buffer has no stateless equivalent
    here, so we run a short power iteration on the (tiny) weight matrix.
    Weight-only work, off the data hot path.
    """
    cout = weight_ocdhw.shape[0]
    w_mat = weight_ocdhw.reshape(cout, -1)
    v = jnp.ones((w_mat.shape[1],), jnp.float32) / jnp.sqrt(float(w_mat.shape[1]))

    def body(_, v):
        u = w_mat @ v
        u = u / (jnp.linalg.norm(u) + 1e-12)
        v = w_mat.T @ u
        v = v / (jnp.linalg.norm(v) + 1e-12)
        return v

    v = lax.fori_loop(0, n_iter, body, v)
    sigma = jnp.linalg.norm(w_mat @ v)
    return weight_ocdhw / sigma


def _upsample_pad(x_ncdhw):
    x = x_ncdhw
    for ax in (2, 3, 4):                         # x2 trilinear (separable)
        x = _upsample_linear_axis(x, ax, 2)
    return jnp.pad(x, ((0, 0), (0, 0), (1, 1), (1, 1), (1, 1)), mode='edge')


def _im2col_3x3x3(x_pad, d2, h2, w2):
    """(N, Cin, Dp, Hp, Wp) -> (N, 27*Cin, D2*H2*W2), K ordered (kd,kh,kw,c)."""
    n, cin = x_pad.shape[:2]
    slabs = []
    for kd in range(3):
        for kh in range(3):
            for kw in range(3):
                slabs.append(lax.slice(
                    x_pad, (0, 0, kd, kh, kw),
                    (n, cin, kd + d2, kh + h2, kw + w2)))
    p = jnp.stack(slabs, axis=1)                 # (N, 27, Cin, D2, H2, W2)
    return p.reshape(n, 27 * cin, d2 * h2 * w2)


def _pick_flat_tile(flat, max_tile=MAX_FLAT_TILE):
    if flat <= max_tile:
        return flat
    for cand in range(max_tile, 127, -128):      # largest lane-dense divisor
        if flat % cand == 0:
            return cand
    return flat                                  # fall back to a single tile


def _round_up(x, m):
    return ((x + m - 1) // m) * m


@jax.jit
def deconv3d_block(x_ncdhw, weight_ocdhw, bias=None):
    """Forward of Deconv3DBlock: (N, Cin, D, H, W) -> (N, Cout, 2D, 2H, 2W).

    `bias` is accepted for API parity but unused: InstanceNorm3d(affine=False)
    subtracts the per-channel mean, which cancels the conv bias exactly.
    """
    del bias
    n, cin, d, h, w = x_ncdhw.shape
    cout = weight_ocdhw.shape[0]
    d2, h2, w2 = 2 * d, 2 * h, 2 * w
    flat = d2 * h2 * w2
    k = 27 * cin

    # ---- XLA glue ----------------------------------------------------------
    # TODO(synk): fuse the x2 trilinear upsample + replication pad + im2col
    # into the kernel (on-the-fly patch build via lane rolls) so only the
    # original-resolution input is read from HBM.
    w_sn = _spectral_normalize(weight_ocdhw)
    w2d = jnp.transpose(w_sn, (0, 2, 3, 4, 1)).reshape(cout, k).astype(jnp.bfloat16)
    x_pad = _upsample_pad(x_ncdhw)
    p = _im2col_3x3x3(x_pad, d2, h2, w2).astype(jnp.bfloat16)

    # ---- Pallas kernel -----------------------------------------------------
    tile_f = _pick_flat_tile(flat)
    ft = flat // tile_f

    # Scoped-VMEM budget sized to the actual buffers with headroom.
    k_pad = _round_up(k, 16)
    cout_pad = _round_up(cout, 8)
    vmem_bytes = (2 * k_pad * tile_f * 2           # double-buffered bf16 patch tiles
                  + 2 * cout_pad * flat * 4        # resident f32 output (+writeback)
                  + ft * cout_pad * tile_f * 4     # f32 conv accumulator scratch
                  + 2 * cout_pad * k_pad * 2       # weight
                  + (4 << 20))                     # headroom
    vmem_bytes = int(min(max(vmem_bytes, 8 << 20), 64 << 20))

    out = pl.pallas_call(
        _deconv_block_kernel,
        out_shape=jax.ShapeDtypeStruct((n, cout, flat), jnp.float32),
        grid_spec=pltpu.PrefetchScalarGridSpec(
            num_scalar_prefetch=0,
            grid=(n, ft),
            in_specs=[
                pl.BlockSpec((None, k, tile_f), lambda ni, ti: (ni, 0, ti)),
                pl.BlockSpec((cout, k), lambda ni, ti: (0, 0)),
            ],
            out_specs=pl.BlockSpec((None, cout, flat),
                                   lambda ni, ti: (ni, 0, 0)),
            scratch_shapes=[
                pltpu.VMEM((ft, cout, tile_f), jnp.float32),   # conv tiles
                pltpu.VMEM((cout, 1), jnp.float32),            # sum
                pltpu.VMEM((cout, 1), jnp.float32),            # sum of squares
            ]),
        compiler_params=pltpu.CompilerParams(
            # Batch axis parallel (uses both TensorCores on v7x when N >= 2);
            # the flat-tile axis carries the InstanceNorm state -> arbitrary.
            dimension_semantics=("parallel", "arbitrary"),
            vmem_limit_bytes=vmem_bytes),
    )(p, w2d)

    # Output is already (N, Cout, D2*H2*W2) in NCDHW order: reshape only.
    return out.reshape(n, cout, d2, h2, w2)


# ---------------------------------------------------------------------------
# Pure-XLA reference of the same module math (conv inputs rounded to bf16 like
# the kernel path; bias kept here to demonstrate it is cancelled by the norm).
# ---------------------------------------------------------------------------
def _reference(x_ncdhw, weight_ocdhw, bias):
    w_sn = _spectral_normalize(weight_ocdhw)
    x_pad = _upsample_pad(x_ncdhw)
    xb = x_pad.astype(jnp.bfloat16).astype(jnp.float32)
    wb = w_sn.astype(jnp.bfloat16).astype(jnp.float32)
    y = lax.conv_general_dilated(
        xb, wb, window_strides=(1, 1, 1), padding='VALID',
        dimension_numbers=('NCDHW', 'OIDHW', 'NCDHW'))
    y = y + bias.reshape(1, -1, 1, 1, 1)
    mean = jnp.mean(y, axis=(2, 3, 4), keepdims=True)
    var = jnp.mean((y - mean) ** 2, axis=(2, 3, 4), keepdims=True)
    return jnp.maximum((y - mean) * lax.rsqrt(var + EPS), 0.0)


if __name__ == "__main__":
    key = jax.random.PRNGKey(0)
    kx, kw_, kb = jax.random.split(key, 3)

    # Small shapes consistent with the module: in_features=4, out_features=8.
    N, CIN, COUT, S = 2, 4, 8, 8
    x = jax.random.normal(kx, (N, CIN, S, S, S), dtype=jnp.float32)

    fan_in = CIN * 3 * 3 * 3
    bound = 1.0 / (fan_in ** 0.5)
    weight = jax.random.uniform(kw_, (COUT, CIN, 3, 3, 3), jnp.float32,
                                minval=-bound, maxval=bound)
    bias = jax.random.uniform(kb, (COUT,), jnp.float32,
                              minval=-bound, maxval=bound)

    out = jax.block_until_ready(deconv3d_block(x, weight, bias))
    assert out.shape == (N, COUT, 2 * S, 2 * S, 2 * S), out.shape

    ref = jax.block_until_ready(_reference(x, weight, bias))
    max_err = float(jnp.max(jnp.abs(out - ref)))
    assert max_err < 2e-3, max_err

    print("KERNEL_OK")
</pallas_src>

<mosaic_0001>
module attributes {stable_mosaic.version = 11 : i64} {
  func.func @_deconv_block_kernel(%arg0: i32, %arg1: i32, %arg2: memref<1x108x2048xbf16, #tpu.memory_space<vmem>>, %arg3: memref<8x108xbf16, #tpu.memory_space<vmem>>, %arg4: memref<1x8x4096xf32, #tpu.memory_space<vmem>>, %arg5: memref<2x8x2048xf32, #tpu.memory_space<vmem>>, %arg6: memref<8x1xf32, #tpu.memory_space<vmem>>, %arg7: memref<8x1xf32, #tpu.memory_space<vmem>>) attributes {dimension_semantics = [#tpu.dimension_semantics<parallel>, #tpu.dimension_semantics<arbitrary>], iteration_bounds = array<i64: 2, 2>, scalar_prefetch = 0 : i64, scratch_operands = 3 : i64, tpu.core_type = #tpu.core_type<tc>, window_params = [{transform_indices = @transform_0, window_bounds = array<i64: 1, 108, 2048>}, {pipeline_mode = #tpu.pipeline_mode<synchronous>, transform_indices = @transform_1, window_bounds = array<i64: 8, 108>}, {transform_indices = @transform_2, window_bounds = array<i64: 1, 8, 4096>}]} {
    %c0_i32 = arith.constant 0 : i32
    %0 = arith.cmpi eq, %arg1, %c0_i32 : i32
    %1 = arith.extui %0 : i1 to i32
    %c0_i32_0 = arith.constant 0 : i32
    %2 = arith.cmpi ne, %1, %c0_i32_0 : i32
    scf.if %2 {
      %cst_18 = arith.constant 0.000000e+00 : f32
      %25 = vector.broadcast %cst_18 : f32 to vector<8x1xf32>
      %c0_19 = arith.constant 0 : index
      %c0_20 = arith.constant 0 : index
      %26 = vector.load %arg6[%c0_19, %c0_20] : memref<8x1xf32, #tpu.memory_space<vmem>>, vector<8x1xf32>
      tpu.vector_store %arg6[%c0_19, %c0_20], %25 {strides = array<i32>} : memref<8x1xf32, #tpu.memory_space<vmem>>, vector<8x1xf32>,
      %cst_21 = arith.constant 0.000000e+00 : f32
      %27 = vector.broadcast %cst_21 : f32 to vector<8x1xf32>
      %c0_22 = arith.constant 0 : index
      %c0_23 = arith.constant 0 : index
      %28 = vector.load %arg7[%c0_22, %c0_23] : memref<8x1xf32, #tpu.memory_space<vmem>>, vector<8x1xf32>
      tpu.vector_store %arg7[%c0_22, %c0_23], %27 {strides = array<i32>} : memref<8x1xf32, #tpu.memory_space<vmem>>, vector<8x1xf32>,
    } else {
    }
    %c0 = arith.constant 0 : index
    %c0_1 = arith.constant 0 : index
    %3 = vector.load %arg3[%c0, %c0_1] : memref<8x108xbf16, #tpu.memory_space<vmem>>, vector<8x108xbf16>
    %c0_2 = arith.constant 0 : index
    %c0_3 = arith.constant 0 : index
    %c0_4 = arith.constant 0 : index
    %4 = vector.load %arg2[%c0_2, %c0_3, %c0_4] : memref<1x108x2048xbf16, #tpu.memory_space<vmem>>, vector<1x108x2048xbf16>
    %5 = vector.shape_cast %4 : vector<1x108x2048xbf16> to vector<108x2048xbf16>
    %cst = arith.constant dense<0.000000e+00> : vector<8x2048xf32>
    %6 = tpu.matmul %3, %5, %cst {dimension_numbers = #tpu.dot_dimension_numbers<[1], [0], [0], [1], [0, 0, 1, 1], [], []>} : vector<8x108xbf16>, vector<108x2048xbf16>, vector<8x2048xf32> -> vector<8x2048xf32>
    %7 = arith.index_cast %arg1 : i32 to index
    %c0_5 = arith.constant 0 : index
    %c0_6 = arith.constant 0 : index
    %8 = vector.load %arg5[%7, %c0_5, %c0_6] : memref<2x8x2048xf32, #tpu.memory_space<vmem>>, vector<1x8x2048xf32>
    %9 = vector.shape_cast %8 : vector<1x8x2048xf32> to vector<8x2048xf32>
    %10 = vector.shape_cast %6 : vector<8x2048xf32> to vector<1x8x2048xf32>
    tpu.vector_store %arg5[%7, %c0_5, %c0_6], %10 {strides = array<i32>} : memref<2x8x2048xf32, #tpu.memory_space<vmem>>, vector<1x8x2048xf32>,
    %c0_7 = arith.constant 0 : index
    %c0_8 = arith.constant 0 : index
    %11 = vector.load %arg6[%c0_7, %c0_8] : memref<8x1xf32, #tpu.memory_space<vmem>>, vector<8x1xf32>
    %cst_9 = arith.constant dense<0.000000e+00> : vector<8xf32>
    %12 = vector.multi_reduction <add>, %6, %cst_9 [1] : vector<8x2048xf32> to vector<8xf32>
    %13 = vector.shape_cast %12 : vector<8xf32> to vector<8x1xf32>
    %14 = arith.addf %11, %13 : vector<8x1xf32>
    %c0_10 = arith.constant 0 : index
    %c0_11 = arith.constant 0 : index
    %15 = vector.load %arg6[%c0_10, %c0_11] : memref<8x1xf32, #tpu.memory_space<vmem>>, vector<8x1xf32>
    tpu.vector_store %arg6[%c0_10, %c0_11], %14 {strides = array<i32>} : memref<8x1xf32, #tpu.memory_space<vmem>>, vector<8x1xf32>,
    %c0_12 = arith.constant 0 : index
    %c0_13 = arith.constant 0 : index
    %16 = vector.load %arg7[%c0_12, %c0_13] : memref<8x1xf32, #tpu.memory_space<vmem>>, vector<8x1xf32>
    %17 = arith.mulf %6, %6 : vector<8x2048xf32>
    %cst_14 = arith.constant dense<0.000000e+00> : vector<8xf32>
    %18 = vector.multi_reduction <add>, %17, %cst_14 [1] : vector<8x2048xf32> to vector<8xf32>
    %19 = vector.shape_cast %18 : vector<8xf32> to vector<8x1xf32>
    %20 = arith.addf %16, %19 : vector<8x1xf32>
    %c0_15 = arith.constant 0 : index
    %c0_16 = arith.constant 0 : index
    %21 = vector.load %arg7[%c0_15, %c0_16] : memref<8x1xf32, #tpu.memory_space<vmem>>, vector<8x1xf32>
    tpu.vector_store %arg7[%c0_15, %c0_16], %20 {strides = array<i32>} : memref<8x1xf32, #tpu.memory_space<vmem>>, vector<8x1xf32>,
    %c1_i32 = arith.constant 1 : i32
    %22 = arith.cmpi eq, %arg1, %c1_i32 : i32
    %23 = arith.extui %22 : i1 to i32
    %c0_i32_17 = arith.constant 0 : i32
    %24 = arith.cmpi ne, %23, %c0_i32_17 : i32
    scf.if %24 {
      %c0_18 = arith.constant 0 : index
      %c0_19 = arith.constant 0 : index
      %25 = vector.load %arg6[%c0_18, %c0_19] : memref<8x1xf32, #tpu.memory_space<vmem>>, vector<8x1xf32>
      %cst_20 = arith.constant 2.44140625E-4 : f32
      %26 = vector.broadcast %cst_20 : f32 to vector<8x1xf32>
      %27 = arith.mulf %25, %26 : vector<8x1xf32>
      %c0_21 = arith.constant 0 : index
      %c0_22 = arith.constant 0 : index
      %28 = vector.load %arg7[%c0_21, %c0_22] : memref<8x1xf32, #tpu.memory_space<vmem>>, vector<8x1xf32>
      %cst_23 = arith.constant 2.44140625E-4 : f32
      %29 = vector.broadcast %cst_23 : f32 to vector<8x1xf32>
      %30 = arith.mulf %28, %29 : vector<8x1xf32>
      %31 = arith.mulf %27, %27 : vector<8x1xf32>
      %32 = arith.subf %30, %31 : vector<8x1xf32>
      %cst_24 = arith.constant 0.000000e+00 : f32
      %33 = vector.broadcast %cst_24 : f32 to vector<8x1xf32>
      %34 = arith.maximumf %32, %33 : vector<8x1xf32>
      %cst_25 = arith.constant 9.99999974E-6 : f32
      %35 = vector.broadcast %cst_25 : f32 to vector<8x1xf32>
      %36 = arith.addf %34, %35 : vector<8x1xf32>
      %37 = math.rsqrt %36 : vector<8x1xf32>
      %c0_26 = arith.constant 0 : index
      %c0_27 = arith.constant 0 : index
      %c0_28 = arith.constant 0 : index
      %38 = vector.load %arg5[%c0_26, %c0_27, %c0_28] : memref<2x8x2048xf32, #tpu.memory_space<vmem>>, vector<1x8x2048xf32>
      %39 = vector.shape_cast %38 : vector<1x8x2048xf32> to vector<8x2048xf32>
      %40 = vector.broadcast %27 : vector<8x1xf32> to vector<8x2048xf32>
      %41 = arith.subf %39, %40 : vector<8x2048xf32>
      %42 = vector.broadcast %37 : vector<8x1xf32> to vector<8x2048xf32>
      %43 = arith.mulf %41, %42 : vector<8x2048xf32>
      %cst_29 = arith.constant 0.000000e+00 : f32
      %44 = vector.broadcast %cst_29 : f32 to vector<8x2048xf32>
      %45 = arith.maximumf %43, %44 : vector<8x2048xf32>
      %c0_30 = arith.constant 0 : index
      %c0_31 = arith.constant 0 : index
      %c0_32 = arith.constant 0 : index
      %46 = vector.load %arg4[%c0_30, %c0_31, %c0_32] : memref<1x8x4096xf32, #tpu.memory_space<vmem>>, vector<1x8x2048xf32>
      %47 = vector.shape_cast %46 : vector<1x8x2048xf32> to vector<8x2048xf32>
      %48 = vector.shape_cast %45 : vector<8x2048xf32> to vector<1x8x2048xf32>
      tpu.vector_store %arg4[%c0_30, %c0_31, %c0_32], %48 {strides = array<i32>} : memref<1x8x4096xf32, #tpu.memory_space<vmem>>, vector<1x8x2048xf32>,
      %c1 = arith.constant 1 : index
      %c0_33 = arith.constant 0 : index
      %c0_34 = arith.constant 0 : index
      %49 = vector.load %arg5[%c1, %c0_33, %c0_34] : memref<2x8x2048xf32, #tpu.memory_space<vmem>>, vector<1x8x2048xf32>
      %50 = vector.shape_cast %49 : vector<1x8x2048xf32> to vector<8x2048xf32>
      %51 = vector.broadcast %27 : vector<8x1xf32> to vector<8x2048xf32>
      %52 = arith.subf %50, %51 : vector<8x2048xf32>
      %53 = vector.broadcast %37 : vector<8x1xf32> to vector<8x2048xf32>
      %54 = arith.mulf %52, %53 : vector<8x2048xf32>
      %cst_35 = arith.constant 0.000000e+00 : f32
      %55 = vector.broadcast %cst_35 : f32 to vector<8x2048xf32>
      %56 = arith.maximumf %54, %55 : vector<8x2048xf32>
      %c0_36 = arith.constant 0 : index
      %c0_37 = arith.constant 0 : index
      %c2048 = arith.constant 2048 : index
      %57 = vector.load %arg4[%c0_36, %c0_37, %c2048] : memref<1x8x4096xf32, #tpu.memory_space<vmem>>, vector<1x8x2048xf32>
      %58 = vector.shape_cast %57 : vector<1x8x2048xf32> to vector<8x2048xf32>
      %59 = vector.shape_cast %56 : vector<8x2048xf32> to vector<1x8x2048xf32>
      tpu.vector_store %arg4[%c0_36, %c0_37, %c2048], %59 {strides = array<i32>} : memref<1x8x4096xf32, #tpu.memory_space<vmem>>, vector<1x8x2048xf32>,
    } else {
    }
    return
  }
  func.func @transform_0(%arg0: i32, %arg1: i32) -> (i32, i32, i32) {
    %c0_i32 = arith.constant 0 : i32
    %c0_i32_0 = arith.constant 0 : i32
    return %arg0, %c0_i32, %arg1 : i32, i32, i32
  }
  func.func @transform_1(%arg0: i32, %arg1: i32) -> (i32, i32) {
    %c0_i32 = arith.constant 0 : i32
    %c0_i32_0 = arith.constant 0 : i32
    %c0_i32_1 = arith.constant 0 : i32
    return %c0_i32, %c0_i32_0 : i32, i32
  }
  func.func @transform_2(%arg0: i32, %arg1: i32) -> (i32, i32, i32) {
    %c0_i32 = arith.constant 0 : i32
    %c0_i32_0 = arith.constant 0 : i32
    %c0_i32_1 = arith.constant 0 : i32
    return %arg0, %c0_i32, %c0_i32_0 : i32, i32, i32
  }
}

</mosaic_0001>

<bundles_post_ra>
// kernel: custom-call
= control target key start
LH: loop header
LB: loop body
LE: loop exit
PB: predicated region body
PF: predicated region fallthrough
CT: control target
= control target key end

     0   :  { %s6_s0 = inlined_call_operand.vmem [shape: f32[108], index: 0, kind: output, shape index: {}]  }

// kernel: deconv3d_block.1
= control target key start
LH: loop header
LB: loop body
LE: loop exit
PB: predicated region body
PF: predicated region fallthrough
CT: control target
= control target key end

     0   :  { %s2405_s9 = smov 0   ;;  %s2407_s10 = smov 0   ;;  %s3124_s0 = inlined_call_operand.vmem [shape: bf16[2,108,4096], index: 0, kind: input, shape index: {}]   ;;  %s3125_s1 = inlined_call_operand.vmem [shape: bf16[8,108], index: 1, kind: input, shape index: {}]   ;;  %s3126_s2 = inlined_call_operand.vmem [shape: f32[2,8,4096], index: 2, kind: output, shape index: {}]  }
   0x1   :  { %s2409_s11 = smov 0   ;;  %s2411_s12 = smov 0  }
   0x2   :  { %s2413_s13 = smov 0   ;;  %s2415_s14 = smov 0  }
   0x3   :  { %s2417_s15 = smov 0  }
   0x4 LB: > { %s21_s16 = sadd.s32 1, %s2378_s13  ;;  %s24_s17 = sadd.s32 1, %s2382_s14  ;;  %s2386_s15 = sphi %s2417_s15, %s12_s15   ;;  %s2382_s14 = sphi %s2415_s14, %s3132_s14   ;;  %s2378_s13 = sphi %s2413_s13, %s3131_s13   ;;  %s2374_s12 = sphi %s2411_s12, %s3130_s12   ;;  %s2370_s11 = sphi %s2409_s11, %s3129_s11   ;;  %s2366_s10 = sphi %s2407_s10, %s3128_s10   ;;  %s2362_s9 = sphi %s2405_s9, %s3127_s9  }
   0x5   : > { %p22_p0 = scmp.ge.s32.totalorder %s21_s16, 2  ;;  %p40_p1 = scmp.ne.s32.totalorder %s2366_s10, %s2362_s9 }
   0x6   : > { %p41_p2 = scmp.eq.s32.totalorder %s2386_s15, 0  ;;  %s33_s21 = sadd.s32 1, %s2366_s10 }
   0x7   : > { %s3134_s16 = smov (%p22_p0, %s21_s16), 0  ;;  %s3136_s17 = smov (!%p22_p0, %s24_s17), %s2382_s14 }
   0x8   : > { %p42_p3 = por %p41_p2, %p40_p1  ;;  %p26_p4 = scmp.ge.s32.totalorder %s3136_s17, 2 }
   0x9   : > { %s29_s18 = ssub.s32 %s2378_s13, %s3134_s16  ;;  %p1678_p6 = scmp.ge.s32.totalorder %s2386_s15, 4 }
   0xa   : > { %s3138_s17 = smov (%p26_p4, %s3136_s17), 0 }
   0xb   : > { %s28_s19 = ssub.s32 %s2382_s14, %s3138_s17  ;;  %116 = sbr.rel (%p1678_p6) target bundleno = 136 (0x88), region = 20 }
   0xc   : > { %s30_s20 = sor.u32 %s29_s18, %s28_s19 }
   0xd   : > { %p31_p5 = scmp.eq.s32.totalorder %s30_s20, 0 }
   0xf   : > { %s2456_s22 = scalar_select %p31_p5, %s2366_s10, %s33_s21  }
  0x10   : > { %119 = sbr.rel (!%p42_p3) target bundleno = 136 (0x88), region = 24  ;;  %s121_s23 = sand.u32 (%p42_p3), 1, %s2366_s10  }
  0x11   : > { %s2268_s24 = smul.u32 (%p42_p3), 896, %s121_s23  ;;  %s1679_s25 = sshll.u32 (%p42_p3), %s2378_s13, 4 }
  0x12   : > { %s2269_s26 = smul.u32 (%p42_p3), 448, %s2382_s14 }
  0x13   : > { %s2470_s4 = scalar_lea.vmem (%p42_p3), [#allocation5], %s2268_s24 }
  0x14   : > { %s126_s27 = sadd.s32 (%p42_p3), %s2269_s26, %s1679_s25 }
  0x15   : > { %s1680_s28 = sshll.u32 %s126_s27, 2 }
  0x16   : > { %s2465_s3 = scalar_lea.vmem %s3124_s0, %s1680_s28 }
  0x17   : > { %v141_v0 = vld [vmem:[%s2465_s3] sm:$0xff]  ;;  %v143_v1 = vld [vmem:[%s2465_s3 + $0x8] sm:$0xff]  ;;  %v145_v2 = vld [vmem:[%s2465_s3 + $0x10] sm:$0xff] }
  0x18   : > { %142 = vst [vmem:[%s2470_s4] sm:$0xff] %v141_v0  ;;  %v147_v3 = vld [vmem:[%s2465_s3 + $0x18] sm:$0xff]  ;;  %v149_v4 = vld [vmem:[%s2465_s3 + $0x20] sm:$0xff]  ;;  %v151_v5 = vld [vmem:[%s2465_s3 + $0x28] sm:$0xff] }
  0x19   : > { %144 = vst [vmem:[%s2470_s4 + $0x8] sm:$0xff] %v143_v1  ;;  %v153_v6 = vld [vmem:[%s2465_s3 + $0x30] sm:$0xff]  ;;  %v155_v7 = vld [vmem:[%s2465_s3 + $0x38] sm:$0xff]  ;;  %v157_v8 = vld [vmem:[%s2465_s3 + $0x80] sm:$0xff] }
  0x1a   : > { %146 = vst [vmem:[%s2470_s4 + $0x10] sm:$0xff] %v145_v2  ;;  %v159_v9 = vld [vmem:[%s2465_s3 + $0x88] sm:$0xff]  ;;  %v161_v10 = vld [vmem:[%s2465_s3 + $0x90] sm:$0xff]  ;;  %v163_v11 = vld [vmem:[%s2465_s3 + $0x98] sm:$0xff] }
  0x1b   : > { %148 = vst [vmem:[%s2470_s4 + $0x18] sm:$0xff] %v147_v3  ;;  %v165_v12 = vld [vmem:[%s2465_s3 + $0xa0] sm:$0xff]  ;;  %v167_v13 = vld [vmem:[%s2465_s3 + $0xa8] sm:$0xff]  ;;  %v169_v14 = vld [vmem:[%s2465_s3 + $0xb0] sm:$0xff] }
  0x1c   : > { %150 = vst [vmem:[%s2470_s4 + $0x20] sm:$0xff] %v149_v4  ;;  %v171_v15 = vld [vmem:[%s2465_s3 + $0xb8] sm:$0xff]  ;;  %v173_v16 = vld [vmem:[%s2465_s3 + $0x100] sm:$0xff]  ;;  %v175_v17 = vld [vmem:[%s2465_s3 + $0x108] sm:$0xff] }
  0x1d   : > { %152 = vst [vmem:[%s2470_s4 + $0x28] sm:$0xff] %v151_v5  ;;  %v177_v18 = vld [vmem:[%s2465_s3 + $0x110] sm:$0xff]  ;;  %v179_v19 = vld [vmem:[%s2465_s3 + $0x118] sm:$0xff]  ;;  %v181_v20 = vld [vmem:[%s2465_s3 + $0x120] sm:$0xff] }
  0x1e   : > { %154 = vst [vmem:[%s2470_s4 + $0x30] sm:$0xff] %v153_v6  ;;  %v183_v21 = vld [vmem:[%s2465_s3 + $0x128] sm:$0xff]  ;;  %v185_v22 = vld [vmem:[%s2465_s3 + $0x130] sm:$0xff]  ;;  %v187_v23 = vld [vmem:[%s2465_s3 + $0x138] sm:$0xff] }
  0x1f   : > { %156 = vst [vmem:[%s2470_s4 + $0x38] sm:$0xff] %v155_v7  ;;  %v189_v24 = vld [vmem:[%s2465_s3 + $0x180] sm:$0xff]  ;;  %v191_v25 = vld [vmem:[%s2465_s3 + $0x188] sm:$0xff]  ;;  %v193_v26 = vld [vmem:[%s2465_s3 + $0x190] sm:$0xff] }
  0x20   : > { %158 = vst [vmem:[%s2470_s4 + $0x40] sm:$0xff] %v157_v8  ;;  %v195_v27 = vld [vmem:[%s2465_s3 + $0x198] sm:$0xff]  ;;  %v197_v28 = vld [vmem:[%s2465_s3 + $0x1a0] sm:$0xff]  ;;  %v199_v29 = vld [vmem:[%s2465_s3 + $0x1a8] sm:$0xff] }
  0x21   : > { %160 = vst [vmem:[%s2470_s4 + $0x48] sm:$0xff] %v159_v9  ;;  %v201_v30 = vld [vmem:[%s2465_s3 + $0x1b0] sm:$0xff]  ;;  %v203_v31 = vld [vmem:[%s2465_s3 + $0x1b8] sm:$0xff]  ;;  %v205_v32 = vld [vmem:[%s2465_s3 + $0x200] sm:$0xff] }
  0x22   : > { %162 = vst [vmem:[%s2470_s4 + $0x50] sm:$0xff] %v161_v10  ;;  %v207_v33 = vld [vmem:[%s2465_s3 + $0x208] sm:$0xff]  ;;  %v209_v34 = vld [vmem:[%s2465_s3 + $0x210] sm:$0xff]  ;;  %v211_v35 = vld [vmem:[%s2465_s3 + $0x218] sm:$0xff] }
  0x23   : > { %164 = vst [vmem:[%s2470_s4 + $0x58] sm:$0xff] %v163_v11  ;;  %v213_v36 = vld [vmem:[%s2465_s3 + $0x220] sm:$0xff]  ;;  %v215_v37 = vld [vmem:[%s2465_s3 + $0x228] sm:$0xff]  ;;  %v217_v38 = vld [vmem:[%s2465_s3 + $0x230] sm:$0xff] }
  0x24   : > { %166 = vst [vmem:[%s2470_s4 + $0x60] sm:$0xff] %v165_v12  ;;  %v219_v39 = vld [vmem:[%s2465_s3 + $0x238] sm:$0xff]  ;;  %v221_v40 = vld [vmem:[%s2465_s3 + $0x280] sm:$0xff]  ;;  %v223_v41 = vld [vmem:[%s2465_s3 + $0x288] sm:$0xff] }
  0x25   : > { %168 = vst [vmem:[%s2470_s4 + $0x68] sm:$0xff] %v167_v13  ;;  %v225_v42 = vld [vmem:[%s2465_s3 + $0x290] sm:$0xff]  ;;  %v227_v43 = vld [vmem:[%s2465_s3 + $0x298] sm:$0xff]  ;;  %v229_v44 = vld [vmem:[%s2465_s3 + $0x2a0] sm:$0xff] }
  0x26   : > { %170 = vst [vmem:[%s2470_s4 + $0x70] sm:$0xff] %v169_v14  ;;  %v231_v45 = vld [vmem:[%s2465_s3 + $0x2a8] sm:$0xff]  ;;  %v233_v46 = vld [vmem:[%s2465_s3 + $0x2b0] sm:$0xff]  ;;  %v235_v47 = vld [vmem:[%s2465_s3 + $0x2b8] sm:$0xff] }
  0x27   : > { %172 = vst [vmem:[%s2470_s4 + $0x78] sm:$0xff] %v171_v15  ;;  %v237_v48 = vld [vmem:[%s2465_s3 + $0x300] sm:$0xff]  ;;  %v239_v49 = vld [vmem:[%s2465_s3 + $0x308] sm:$0xff]  ;;  %v241_v50 = vld [vmem:[%s2465_s3 + $0x310] sm:$0xff] }
  0x28   : > { %174 = vst [vmem:[%s2470_s4 + $0x80] sm:$0xff] %v173_v16  ;;  %v243_v51 = vld [vmem:[%s2465_s3 + $0x318] sm:$0xff]  ;;  %v245_v52 = vld [vmem:[%s2465_s3 + $0x320] sm:$0xff]  ;;  %v247_v53 = vld [vmem:[%s2465_s3 + $0x328] sm:$0xff] }
  0x29   : > { %176 = vst [vmem:[%s2470_s4 + $0x88] sm:$0xff] %v175_v17  ;;  %v249_v54 = vld [vmem:[%s2465_s3 + $0x330] sm:$0xff]  ;;  %v251_v55 = vld [vmem:[%s2465_s3 + $0x338] sm:$0xff]  ;;  %v253_v56 = vld [vmem:[%s2465_s3 + $0x380] sm:$0xff] }
  0x2a   : > { %178 = vst [vmem:[%s2470_s4 + $0x90] sm:$0xff] %v177_v18  ;;  %v255_v57 = vld [vmem:[%s2465_s3 + $0x388] sm:$0xff]  ;;  %v257_v58 = vld [vmem:[%s2465_s3 + $0x390] sm:$0xff]  ;;  %v259_v59 = vld [vmem:[%s2465_s3 + $0x398] sm:$0xff] }
  0x2b   : > { %180 = vst [vmem:[%s2470_s4 + $0x98] sm:$0xff] %v179_v19  ;;  %v261_v60 = vld [vmem:[%s2465_s3 + $0x3a0] sm:$0xff]  ;;  %v263_v61 = vld [vmem:[%s2465_s3 + $0x3a8] sm:$0xff]  ;;  %v265_v62 = vld [vmem:[%s2465_s3 + $0x3b0] sm:$0xff] }
  0x2c   : > { %182 = vst [vmem:[%s2470_s4 + $0xa0] sm:$0xff] %v181_v20  ;;  %v267_v63 = vld [vmem:[%s2465_s3 + $0x3b8] sm:$0xff]  ;;  %v269_v0 = vld [vmem:[%s2465_s3 + $0x400] sm:$0xff]  ;;  %v271_v1 = vld [vmem:[%s2465_s3 + $0x408] sm:$0xff] }
  0x2d   : > { %184 = vst [vmem:[%s2470_s4 + $0xa8] sm:$0xff] %v183_v21  ;;  %v273_v2 = vld [vmem:[%s2465_s3 + $0x410] sm:$0xff]  ;;  %v275_v3 = vld [vmem:[%s2465_s3 + $0x418] sm:$0xff]  ;;  %v277_v4 = vld [vmem:[%s2465_s3 + $0x420] sm:$0xff] }
  0x2e   : > { %186 = vst [vmem:[%s2470_s4 + $0xb0] sm:$0xff] %v185_v22  ;;  %v279_v5 = vld [vmem:[%s2465_s3 + $0x428] sm:$0xff]  ;;  %v281_v6 = vld [vmem:[%s2465_s3 + $0x430] sm:$0xff]  ;;  %v283_v7 = vld [vmem:[%s2465_s3 + $0x438] sm:$0xff] }
  0x2f   : > { %188 = vst [vmem:[%s2470_s4 + $0xb8] sm:$0xff] %v187_v23  ;;  %v285_v8 = vld [vmem:[%s2465_s3 + $0x480] sm:$0xff]  ;;  %v287_v9 = vld [vmem:[%s2465_s3 + $0x488] sm:$0xff]  ;;  %v289_v10 = vld [vmem:[%s2465_s3 + $0x490] sm:$0xff] }
  0x30   : > { %190 = vst [vmem:[%s2470_s4 + $0xc0] sm:$0xff] %v189_v24  ;;  %v291_v11 = vld [vmem:[%s2465_s3 + $0x498] sm:$0xff]  ;;  %v293_v12 = vld [vmem:[%s2465_s3 + $0x4a0] sm:$0xff]  ;;  %v295_v13 = vld [vmem:[%s2465_s3 + $0x4a8] sm:$0xff] }
  0x31   : > { %192 = vst [vmem:[%s2470_s4 + $0xc8] sm:$0xff] %v191_v25  ;;  %v297_v14 = vld [vmem:[%s2465_s3 + $0x4b0] sm:$0xff]  ;;  %v299_v15 = vld [vmem:[%s2465_s3 + $0x4b8] sm:$0xff]  ;;  %v301_v16 = vld [vmem:[%s2465_s3 + $0x500] sm:$0xff] }
  0x32   : > { %194 = vst [vmem:[%s2470_s4 + $0xd0] sm:$0xff] %v193_v26  ;;  %v303_v17 = vld [vmem:[%s2465_s3 + $0x508] sm:$0xff]  ;;  %v305_v18 = vld [vmem:[%s2465_s3 + $0x510] sm:$0xff]  ;;  %v307_v19 = vld [vmem:[%s2465_s3 + $0x518] sm:$0xff] }
  0x33   : > { %196 = vst [vmem:[%s2470_s4 + $0xd8] sm:$0xff] %v195_v27  ;;  %v309_v20 = vld [vmem:[%s2465_s3 + $0x520] sm:$0xff]  ;;  %v311_v21 = vld [vmem:[%s2465_s3 + $0x528] sm:$0xff]  ;;  %v313_v22 = vld [vmem:[%s2465_s3 + $0x530] sm:$0xff] }
  0x34   : > { %198 = vst [vmem:[%s2470_s4 + $0xe0] sm:$0xff] %v197_v28  ;;  %v315_v23 = vld [vmem:[%s2465_s3 + $0x538] sm:$0xff]  ;;  %v317_v24 = vld [vmem:[%s2465_s3 + $0x580] sm:$0xff]  ;;  %v319_v25 = vld [vmem:[%s2465_s3 + $0x588] sm:$0xff] }
  0x35   : > { %200 = vst [vmem:[%s2470_s4 + $0xe8] sm:$0xff] %v199_v29  ;;  %v321_v26 = vld [vmem:[%s2465_s3 + $0x590] sm:$0xff]  ;;  %v323_v27 = vld [vmem:[%s2465_s3 + $0x598] sm:$0xff]  ;;  %v325_v28 = vld [vmem:[%s2465_s3 + $0x5a0] sm:$0xff] }
  0x36   : > { %202 = vst [vmem:[%s2470_s4 + $0xf0] sm:$0xff] %v201_v30  ;;  %v327_v29 = vld [vmem:[%s2465_s3 + $0x5a8] sm:$0xff]  ;;  %v329_v30 = vld [vmem:[%s2465_s3 + $0x5b0] sm:$0xff] }
  0x37   : > { %204 = vst [vmem:[%s2470_s4 + $0xf8] sm:$0xff] %v203_v31  ;;  %v331_v31 = vld [vmem:[%s2465_s3 + $0x5b8] sm:$0xff] }
  0x38   : > { %206 = vst [vmem:[%s2470_s4 + $0x100] sm:$0xff] %v205_v32  ;;  %v333_v32 = vld [vmem:[%s2465_s3 + $0x600] sm:$0xff] }
  0x39   : > { %208 = vst [vmem:[%s2470_s4 + $0x108] sm:$0xff] %v207_v33  ;;  %v335_v33 = vld [vmem:[%s2465_s3 + $0x608] sm:$0xff] }
  0x3a   : > { %210 = vst [vmem:[%s2470_s4 + $0x110] sm:$0xff] %v209_v34  ;;  %v337_v34 = vld [vmem:[%s2465_s3 + $0x610] sm:$0xff] }
  0x3b   : > { %212 = vst [vmem:[%s2470_s4 + $0x118] sm:$0xff] %v211_v35  ;;  %v339_v35 = vld [vmem:[%s2465_s3 + $0x618] sm:$0xff] }
  0x3c   : > { %214 = vst [vmem:[%s2470_s4 + $0x120] sm:$0xff] %v213_v36  ;;  %v341_v36 = vld [vmem:[%s2465_s3 + $0x620] sm:$0xff] }
  0x3d   : > { %216 = vst [vmem:[%s2470_s4 + $0x128] sm:$0xff] %v215_v37  ;;  %v343_v37 = vld [vmem:[%s2465_s3 + $0x628] sm:$0xff] }
  0x3e   : > { %218 = vst [vmem:[%s2470_s4 + $0x130] sm:$0xff] %v217_v38  ;;  %v345_v38 = vld [vmem:[%s2465_s3 + $0x630] sm:$0xff] }
  0x3f   : > { %220 = vst [vmem:[%s2470_s4 + $0x138] sm:$0xff] %v219_v39  ;;  %v347_v39 = vld [vmem:[%s2465_s3 + $0x638] sm:$0xff] }
  0x40   : > { %222 = vst [vmem:[%s2470_s4 + $0x140] sm:$0xff] %v221_v40  ;;  %v349_v40 = vld [vmem:[%s2465_s3 + $0x680] sm:$0xff] }
  0x41   : > { %224 = vst [vmem:[%s2470_s4 + $0x148] sm:$0xff] %v223_v41  ;;  %v351_v41 = vld [vmem:[%s2465_s3 + $0x688] sm:$0xff] }
  0x42   : > { %226 = vst [vmem:[%s2470_s4 + $0x150] sm:$0xff] %v225_v42  ;;  %v353_v42 = vld [vmem:[%s2465_s3 + $0x690] sm:$0xff] }
  0x43   : > { %228 = vst [vmem:[%s2470_s4 + $0x158] sm:$0xff] %v227_v43  ;;  %v355_v43 = vld [vmem:[%s2465_s3 + $0x698] sm:$0xff] }
  0x44   : > { %230 = vst [vmem:[%s2470_s4 + $0x160] sm:$0xff] %v229_v44  ;;  %v357_v44 = vld [vmem:[%s2465_s3 + $0x6a0] sm:$0xff] }
  0x45   : > { %232 = vst [vmem:[%s2470_s4 + $0x168] sm:$0xff] %v231_v45  ;;  %v359_v45 = vld [vmem:[%s2465_s3 + $0x6a8] sm:$0xff] }
  0x46   : > { %234 = vst [vmem:[%s2470_s4 + $0x170] sm:$0xff] %v233_v46  ;;  %v361_v46 = vld [vmem:[%s2465_s3 + $0x6b0] sm:$0xff] }
  0x47   : > { %236 = vst [vmem:[%s2470_s4 + $0x178] sm:$0xff] %v235_v47  ;;  %v363_v47 = vld [vmem:[%s2465_s3 + $0x6b8] sm:$0xff] }
  0x48   : > { %238 = vst [vmem:[%s2470_s4 + $0x180] sm:$0xff] %v237_v48 }
  0x49   : > { %240 = vst [vmem:[%s2470_s4 + $0x188] sm:$0xff] %v239_v49 }
  0x4a   : > { %242 = vst [vmem:[%s2470_s4 + $0x190] sm:$0xff] %v241_v50 }
  0x4b   : > { %244 = vst [vmem:[%s2470_s4 + $0x198] sm:$0xff] %v243_v51 }
  0x4c   : > { %246 = vst [vmem:[%s2470_s4 + $0x1a0] sm:$0xff] %v245_v52 }
  0x4d   : > { %248 = vst [vmem:[%s2470_s4 + $0x1a8] sm:$0xff] %v247_v53 }
  0x4e   : > { %250 = vst [vmem:[%s2470_s4 + $0x1b0] sm:$0xff] %v249_v54 }
  0x4f   : > { %252 = vst [vmem:[%s2470_s4 + $0x1b8] sm:$0xff] %v251_v55 }
  0x50   : > { %254 = vst [vmem:[%s2470_s4 + $0x1c0] sm:$0xff] %v253_v56 }
  0x51   : > { %256 = vst [vmem:[%s2470_s4 + $0x1c8] sm:$0xff] %v255_v57 }
  0x52   : > { %258 = vst [vmem:[%s2470_s4 + $0x1d0] sm:$0xff] %v257_v58 }
  0x53   : > { %260 = vst [vmem:[%s2470_s4 + $0x1d8] sm:$0xff] %v259_v59 }
  0x54   : > { %262 = vst [vmem:[%s2470_s4 + $0x1e0] sm:$0xff] %v261_v60 }
  0x55   : > { %264 = vst [vmem:[%s2470_s4 + $0x1e8] sm:$0xff] %v263_v61 }
  0x56   : > { %266 = vst [vmem:[%s2470_s4 + $0x1f0] sm:$0xff] %v265_v62 }
  0x57   : > { %268 = vst [vmem:[%s2470_s4 + $0x1f8] sm:$0xff] %v267_v63 }
  0x58   : > { %270 = vst [vmem:[%s2470_s4 + $0x200] sm:$0xff] %v269_v0 }
  0x59   : > { %272 = vst [vmem:[%s2470_s4 + $0x208] sm:$0xff] %v271_v1 }
  0x5a   : > { %274 = vst [vmem:[%s2470_s4 + $0x210] sm:$0xff] %v273_v2 }
  0x5b   : > { %276 = vst [vmem:[%s2470_s4 + $0x218] sm:$0xff] %v275_v3 }
  0x5c   : > { %278 = vst [vmem:[%s2470_s4 + $0x220] sm:$0xff] %v277_v4 }
  0x5d   : > { %280 = vst [vmem:[%s2470_s4 + $0x228] sm:$0xff] %v279_v5 }
  0x5e   : > { %282 = vst [vmem:[%s2470_s4 + $0x230] sm:$0xff] %v281_v6 }
  0x5f   : > { %284 = vst [vmem:[%s2470_s4 + $0x238] sm:$0xff] %v283_v7 }
  0x60   : > { %286 = vst [vmem:[%s2470_s4 + $0x240] sm:$0xff] %v285_v8 }
  0x61   : > { %288 = vst [vmem:[%s2470_s4 + $0x248] sm:$0xff] %v287_v9 }
  0x62   : > { %290 = vst [vmem:[%s2470_s4 + $0x250] sm:$0xff] %v289_v10 }
  0x63   : > { %292 = vst [vmem:[%s2470_s4 + $0x258] sm:$0xff] %v291_v11 }
  0x64   : > { %294 = vst [vmem:[%s2470_s4 + $0x260] sm:$0xff] %v293_v12 }
  0x65   : > { %296 = vst [vmem:[%s2470_s4 + $0x268] sm:$0xff] %v295_v13 }
  0x66   : > { %298 = vst [vmem:[%s2470_s4 + $0x270] sm:$0xff] %v297_v14 }
  0x67   : > { %300 = vst [vmem:[%s2470_s4 + $0x278] sm:$0xff] %v299_v15 }
  0x68   : > { %302 = vst [vmem:[%s2470_s4 + $0x280] sm:$0xff] %v301_v16 }
  0x69   : > { %304 = vst [vmem:[%s2470_s4 + $0x288] sm:$0xff] %v303_v17 }
  0x6a   : > { %306 = vst [vmem:[%s2470_s4 + $0x290] sm:$0xff] %v305_v18 }
  0x6b   : > { %308 = vst [vmem:[%s2470_s4 + $0x298] sm:$0xff] %v307_v19 }
  0x6c   : > { %310 = vst [vmem:[%s2470_s4 + $0x2a0] sm:$0xff] %v309_v20 }
  0x6d   : > { %312 = vst [vmem:[%s2470_s4 + $0x2a8] sm:$0xff] %v311_v21 }
  0x6e   : > { %314 = vst [vmem:[%s2470_s4 + $0x2b0] sm:$0xff] %v313_v22 }
  0x6f   : > { %316 = vst [vmem:[%s2470_s4 + $0x2b8] sm:$0xff] %v315_v23 }
  0x70   : > { %318 = vst [vmem:[%s2470_s4 + $0x2c0] sm:$0xff] %v317_v24 }
  0x71   : > { %320 = vst [vmem:[%s2470_s4 + $0x2c8] sm:$0xff] %v319_v25 }
  0x72   : > { %322 = vst [vmem:[%s2470_s4 + $0x2d0] sm:$0xff] %v321_v26 }
  0x73   : > { %324 = vst [vmem:[%s2470_s4 + $0x2d8] sm:$0xff] %v323_v27 }
  0x74   : > { %326 = vst [vmem:[%s2470_s4 + $0x2e0] sm:$0xff] %v325_v28 }
  0x75   : > { %328 = vst [vmem:[%s2470_s4 + $0x2e8] sm:$0xff] %v327_v29 }
  0x76   : > { %330 = vst [vmem:[%s2470_s4 + $0x2f0] sm:$0xff] %v329_v30 }
  0x77   : > { %332 = vst [vmem:[%s2470_s4 + $0x2f8] sm:$0xff] %v331_v31 }
  0x78   : > { %334 = vst [vmem:[%s2470_s4 + $0x300] sm:$0xff] %v333_v32 }
  0x79   : > { %336 = vst [vmem:[%s2470_s4 + $0x308] sm:$0xff] %v335_v33 }
  0x7a   : > { %338 = vst [vmem:[%s2470_s4 + $0x310] sm:$0xff] %v337_v34 }
  0x7b   : > { %340 = vst [vmem:[%s2470_s4 + $0x318] sm:$0xff] %v339_v35 }
  0x7c   : > { %342 = vst [vmem:[%s2470_s4 + $0x320] sm:$0xff] %v341_v36 }
  0x7d   : > { %344 = vst [vmem:[%s2470_s4 + $0x328] sm:$0xff] %v343_v37 }
  0x7e   : > { %346 = vst [vmem:[%s2470_s4 + $0x330] sm:$0xff] %v345_v38 }
  0x7f   : > { %348 = vst [vmem:[%s2470_s4 + $0x338] sm:$0xff] %v347_v39 }
  0x80   : > { %350 = vst [vmem:[%s2470_s4 + $0x340] sm:$0xff] %v349_v40 }
  0x81   : > { %352 = vst [vmem:[%s2470_s4 + $0x348] sm:$0xff] %v351_v41 }
  0x82   : > { %354 = vst [vmem:[%s2470_s4 + $0x350] sm:$0xff] %v353_v42 }
  0x83   : > { %356 = vst [vmem:[%s2470_s4 + $0x358] sm:$0xff] %v355_v43 }
  0x84   : > { %358 = vst [vmem:[%s2470_s4 + $0x360] sm:$0xff] %v357_v44 }
  0x85   : > { %360 = vst [vmem:[%s2470_s4 + $0x368] sm:$0xff] %v359_v45 }
  0x86   : > { %362 = vst [vmem:[%s2470_s4 + $0x370] sm:$0xff] %v361_v46 }
  0x87   : > { %364 = vst [vmem:[%s2470_s4 + $0x378] sm:$0xff] %v363_v47 }
  0x88 PF: > { %p1681_p7 = scmp.ge.s32.totalorder %s2386_s15, 1  ;;  %p369_p8 = scmp.lt.s32.totalorder %s2386_s15, 5 }
  0x8a   : > { %p370_p9 = pnand %p1681_p7, %p369_p8 }
  0x8b   : > { %s376_s5 = sand.u32 (!%p370_p9), 1, %s2362_s9   ;;  %p398_p10 = scmp.lt.s32.totalorder (!%p370_p9), %s2374_s12, 1 }
  0x8c   : > { %373 = sbr.rel (%p370_p9) target bundleno = 717 (0x2cd), region = 47  ;;  %p1684_p11 = scmp.ne.s32.totalorder (!%p370_p9), %s2370_s11, 0 }
  0x8d   : > { %s2270_s6 = smul.u32 (!%p370_p9), 896, %s376_s5 }
  0x8f   : > { %s2703_s20 = scalar_lea.vmem (!%p370_p9), [#allocation5], %s2270_s6 }
  0x91   : > { %s3140_s12 = smov (!%p398_p10, %s2374_s12), 1  ;;  %407 = sbr.rel (%p1684_p11) target bundleno = 153 (0x99), region = 55 }
  0x92   : > { %s2154_s7 = sshll.u32 %s3140_s12, 8 }
  0x93   : > { %s2701_s19 = scalar_lea.vmem %s3126_s2, %s2154_s7 }
  0x96   : > { %vm408_vm0 = vcmask 7168   ;;  %v2388_v48 = vmov 0.0  }
  0x97   : > { %409 = vst.msk [vmem:[#allocation3] sm:$0xff] %vm408_vm0, %v2388_v48 }
  0x98   : > { %410 = vst.msk [vmem:[#allocation4] sm:$0xff] %vm408_vm0, %v2388_v48 }
  0x99 PF: > { %v2071_v49 = vld [vmem:[%s2703_s20 + $0x300] sm:$0xf]  ;;  %vm1072_vm1 = vcmask 1045504   ;;  %v2251_v52 = vld [vmem:[%s2703_s20 + $0x304] sm:$0xf]  ;;  %vm1068_vm2 = vcmask 883712  }
  0x9a   : > { %v2259_v50 = vld [vmem:[%s2703_s20 + $0x33c] sm:$0x30]  ;;  %v2073_v53 = vld [vmem:[%s2703_s20 + $0x340] sm:$0x30]  ;;  %v2079_v54 = vld [vmem:[%s2703_s20 + $0x308] sm:$0xf] }
  0x9b   : > { %v2072_v51 = vor.u32 %v2259_v50, %v2071_v49  ;;  %v2076_v55 = vor.u32 %v2251_v52, %v2073_v53  ;;  %v2260_v56 = vld [vmem:[%s2703_s20 + $0x344] sm:$0x30]  ;;  %v2252_v57 = vld [vmem:[%s2703_s20 + $0x30c] sm:$0xf]  ;;  %v2007_v62 = vld [vmem:[%s2703_s20 + $0x280] sm:$0xf] }
  0x9c   : > { %v2081_v58 = vld [vmem:[%s2703_s20 + $0x348] sm:$0x30]  ;;  %v2080_v60 = vor.u32 %v2260_v56, %v2079_v54  ;;  %v2243_v63 = vld [vmem:[%s2703_s20 + $0x2bc] sm:$0xf0]  ;;  %v2235_v2 = vld [vmem:[%s2703_s20 + $0x284] sm:$0xf] }
  0x9d   : > { %v1074_v59 = vsel %vm1072_vm1, %v2072_v51, 0  ;;  %v2084_v61 = vor.u32 %v2252_v57, %v2081_v58  ;;  %v1077_v0 = vsel %vm1072_vm1, %v2076_v55, 0  ;;  %v2008_v1 = vor.u32 %v2243_v63, %v2007_v62  ;;  %v2009_v3 = vld [vmem:[%s2703_s20 + $0x2c0] sm:$0xf0]  ;;  %v2015_v7 = vld [vmem:[%s2703_s20 + $0x288] sm:$0xf] }
  0x9e   : > { %1122 = vmatpush.bf16.msra.mxu0 %v1074_v59  ;;  %1135 = vmatpush.bf16.msra.mxu1 %v1077_v0  ;;  %v1080_v4 = vsel %vm1072_vm1, %v2080_v60, 0  ;;  %v2012_v6 = vor.u32 %v2235_v2, %v2009_v3  ;;  %v2244_v8 = vld [vmem:[%s2703_s20 + $0x2c4] sm:$0xf0]  ;;  %v2236_v10 = vld [vmem:[%s2703_s20 + $0x28c] sm:$0xf]  ;;  %s2267_s21 = sshll.u32 %s2370_s11, 7 }
  0x9f   : > { %v1083_v5 = vsel %vm1072_vm1, %v2084_v61, 0  ;;  %1148 = vmatpush.bf16.msra.mxu2 %v1080_v4  ;;  %v2016_v9 = vor.u32 %v2244_v8, %v2015_v7  ;;  %v2017_v11 = vld [vmem:[%s2703_s20 + $0x2c8] sm:$0xf0]  ;;  %v1943_v12 = vld [vmem:[%s2703_s20 + $0x200] sm:$0xf]  ;;  %s2984_s23 = scalar_lea.vmem [#allocation2], %s2267_s21 }
  0xa0   : > { %1161 = vmatpush.bf16.msra.mxu3 %v1083_v5  ;;  %v2020_v13 = vor.u32 %v2236_v10, %v2017_v11  ;;  %v2227_v14 = vld [vmem:[%s2703_s20 + $0x23c] sm:$0xf0]  ;;  %v2219_v15 = vld [vmem:[%s2703_s20 + $0x204] sm:$0xf]  ;;  %v1951_v18 = vld [vmem:[%s2703_s20 + $0x208] sm:$0xf] }
  0xa1   : > { %v1945_v16 = vld [vmem:[%s2703_s20 + $0x240] sm:$0xf0]  ;;  %v1944_v17 = vor.u32 %v2227_v14, %v1943_v12  ;;  %v2228_v19 = vld [vmem:[%s2703_s20 + $0x244] sm:$0xf0]  ;;  %v2220_v20 = vld [vmem:[%s2703_s20 + $0x20c] sm:$0xf] }
  0xa2   : > { %1123 = vmatpush.bf16.msra.mxu0 %v2008_v1  ;;  %1136 = vmatpush.bf16.msra.mxu1 %v2012_v6  ;;  %v1948_v21 = vor.u32 %v2219_v15, %v1945_v16  ;;  %v1953_v22 = vld [vmem:[%s2703_s20 + $0x248] sm:$0xf0]  ;;  %v1879_v23 = vld [vmem:[%s2703_s20 + $0x180] sm:$0xf]  ;;  %v1952_v25 = vor.u32 %v2228_v19, %v1951_v18  ;;  %v2203_v27 = vld [vmem:[%s2703_s20 + $0x184] sm:$0xf] }
  0xa3   : > { %v2211_v24 = vld [vmem:[%s2703_s20 + $0x1bc] sm:$0xf0]  ;;  %1149 = vmatpush.bf16.msra.mxu2 %v2016_v9  ;;  %v1956_v26 = vor.u32 %v2220_v20, %v1953_v22  ;;  %v1881_v28 = vld [vmem:[%s2703_s20 + $0x1c0] sm:$0xf0]  ;;  %v1887_v29 = vld [vmem:[%s2703_s20 + $0x188] sm:$0xf] }
  0xa4   : > { %1162 = vmatpush.bf16.msra.mxu3 %v2020_v13  ;;  %v2212_v30 = vld [vmem:[%s2703_s20 + $0x1c4] sm:$0xf0]  ;;  %v2204_v31 = vld [vmem:[%s2703_s20 + $0x18c] sm:$0xf]  ;;  %v1880_v33 = vor.u32 %v2211_v24, %v1879_v23  ;;  %v1884_v34 = vor.u32 %v2203_v27, %v1881_v28  ;;  %v1815_v35 = vld [vmem:[%s2703_s20 + $0x100] sm:$0xf] }
  0xa5   : > { %v1889_v32 = vld [vmem:[%s2703_s20 + $0x1c8] sm:$0xf0]  ;;  %v2195_v36 = vld [vmem:[%s2703_s20 + $0x13c] sm:$0xf0]  ;;  %v1888_v37 = vor.u32 %v2212_v30, %v1887_v29  ;;  %v2187_v39 = vld [vmem:[%s2703_s20 + $0x104] sm:$0xf] }
  0xa6   : > { %1124 = vmatpush.bf16.msra.mxu0 %v1944_v17  ;;  %1137 = vmatpush.bf16.msra.mxu1 %v1948_v21  ;;  %v1892_v38 = vor.u32 %v2204_v31, %v1889_v32  ;;  %v1817_v40 = vld [vmem:[%s2703_s20 + $0x140] sm:$0xf0]  ;;  %v1823_v41 = vld [vmem:[%s2703_s20 + $0x108] sm:$0xf]  ;;  %v2188_v43 = vld [vmem:[%s2703_s20 + $0x10c] sm:$0xf]  ;;  %v1816_v45 = vor.u32 %v2195_v36, %v1815_v35 }
  0xa7   : > { %1150 = vmatpush.bf16.msra.mxu2 %v1952_v25  ;;  %v2196_v42 = vld [vmem:[%s2703_s20 + $0x144] sm:$0xf0]  ;;  %v1825_v44 = vld [vmem:[%s2703_s20 + $0x148] sm:$0xf0]  ;;  %v1751_v46 = vld [vmem:[%s2703_s20 + $0x80] sm:$0xf]  ;;  %v1820_v47 = vor.u32 %v2187_v39, %v1817_v40 }
  0xa8   : > { %1163 = vmatpush.bf16.msra.mxu3 %v1956_v26  ;;  %v2179_v48 = vld [vmem:[%s2703_s20 + $0xbc] sm:$0xf0]  ;;  %v2171_v49 = vld [vmem:[%s2703_s20 + $0x84] sm:$0xf]  ;;  %v1824_v51 = vor.u32 %v2196_v42, %v1823_v41  ;;  %v1828_v52 = vor.u32 %v2188_v43, %v1825_v44  ;;  %v1759_v53 = vld [vmem:[%s2703_s20 + $0x88] sm:$0xf] }
  0xa9   : > { %v1753_v50 = vld [vmem:[%s2703_s20 + $0xc0] sm:$0xf0]  ;;  %v2180_v54 = vld [vmem:[%s2703_s20 + $0xc4] sm:$0xf0]  ;;  %v2172_v55 = vld [vmem:[%s2703_s20 + $0x8c] sm:$0xf]  ;;  %v1752_v59 = vor.u32 %v2179_v48, %v1751_v46 }
  0xaa   : > { %1125 = vmatpush.bf16.msra.mxu0 %v1880_v33  ;;  %1138 = vmatpush.bf16.msra.mxu1 %v1884_v34  ;;  %v1761_v56 = vld [vmem:[%s2703_s20 + $0xc8] sm:$0xf0]  ;;  %v1687_v57 = vld [vmem:[%s2703_s20] sm:$0xf]  ;;  %v2155_v60 = vld [vmem:[%s2703_s20 + $0x4] sm:$0xf]  ;;  %v1756_v1 = vor.u32 %v2171_v49, %v1753_v50  ;;  %v1760_v5 = vor.u32 %v2180_v54, %v1759_v53 }
  0xab   : > { %1151 = vmatpush.bf16.msra.mxu2 %v1888_v37  ;;  %v2163_v58 = vld [vmem:[%s2703_s20 + $0x3c] sm:$0xf0]  ;;  %v1689_v61 = vld [vmem:[%s2703_s20 + $0x40] sm:$0xf0]  ;;  %v2087_v62 = vld [vmem:[%s2703_s20 + $0x310] sm:$0xf]  ;;  %v1764_v6 = vor.u32 %v2172_v55, %v1761_v56 }
  0xac   : > { %1164 = vmatpush.bf16.msra.mxu3 %v1892_v38  ;;  %v2261_v63 = vld [vmem:[%s2703_s20 + $0x34c] sm:$0x30]  ;;  %v2253_v0 = vld [vmem:[%s2703_s20 + $0x314] sm:$0xf]  ;;  %v2095_v3 = vld [vmem:[%s2703_s20 + $0x318] sm:$0xf]  ;;  %v1688_v16 = vor.u32 %v2163_v58, %v1687_v57  ;;  %v1692_v17 = vor.u32 %v2155_v60, %v1689_v61 }
  0xad   : > { %v2089_v2 = vld [vmem:[%s2703_s20 + $0x350] sm:$0x30]  ;;  %v2262_v4 = vld [vmem:[%s2703_s20 + $0x354] sm:$0x30]  ;;  %v1695_v7 = vld [vmem:[%s2703_s20 + $0x8] sm:$0xf]  ;;  %v2088_v8 = vor.u32 %v2261_v63, %v2087_v62 }
  0xae   : > { %1126 = vmatpush.bf16.msra.mxu0 %v1816_v45  ;;  %1139 = vmatpush.bf16.msra.mxu1 %v1820_v47  ;;  %v2254_v9 = vld [vmem:[%s2703_s20 + $0x31c] sm:$0xf]  ;;  %v2164_v11 = vld [vmem:[%s2703_s20 + $0x44] sm:$0xf0]  ;;  %v2156_v12 = vld [vmem:[%s2703_s20 + $0xc] sm:$0xf]  ;;  %v2092_v14 = vor.u32 %v2253_v0, %v2089_v2  ;;  %v2096_v15 = vor.u32 %v2262_v4, %v2095_v3 }
  0xaf   : > { %1152 = vmatpush.bf16.msra.mxu2 %v1824_v51  ;;  %v2097_v10 = vld [vmem:[%s2703_s20 + $0x358] sm:$0x30]  ;;  %v1697_v13 = vld [vmem:[%s2703_s20 + $0x48] sm:$0xf0]  ;;  %v1696_v19 = vor.u32 %v2164_v11, %v1695_v7  ;;  %v1086_v21 = vsel %vm1072_vm1, %v2088_v8, 0  ;;  %vm1367_vm3 = vcmask 7168  }
  0xb0   : > { %1165 = vmatpush.bf16.msra.mxu3 %v1828_v52  ;;  %v2100_v18 = vor.u32 %v2254_v9, %v2097_v10  ;;  %v1700_v20 = vor.u32 %v2156_v12, %v1697_v13  ;;  %v2023_v22 = vld [vmem:[%s2703_s20 + $0x290] sm:$0xf]  ;;  %v1089_v24 = vsel %vm1072_vm1, %v2092_v14, 0  ;;  %v1092_v25 = vsel %vm1072_vm1, %v2096_v15, 0  ;;  %v2237_v26 = vld [vmem:[%s2703_s20 + $0x294] sm:$0xf] }
  0xb1   : > { %v2245_v23 = vld [vmem:[%s2703_s20 + $0x2cc] sm:$0xf0]  ;;  %v2025_v27 = vld [vmem:[%s2703_s20 + $0x2d0] sm:$0xf0]  ;;  %v2031_v28 = vld [vmem:[%s2703_s20 + $0x298] sm:$0xf] }
  0xb2   : > { %1127 = vmatpush.bf16.msra.mxu0 %v1752_v59  ;;  %1140 = vmatpush.bf16.msra.mxu1 %v1756_v1  ;;  %v2246_v29 = vld [vmem:[%s2703_s20 + $0x2d4] sm:$0xf0]  ;;  %v1095_v30 = vsel %vm1072_vm1, %v2100_v18, 0  ;;  %v2024_v31 = vor.u32 %v2245_v23, %v2023_v22  ;;  %v2238_v32 = vld [vmem:[%s2703_s20 + $0x29c] sm:$0xf]  ;;  %v2028_v36 = vor.u32 %v2237_v26, %v2025_v27  ;;  %p2151_p12 = scmp.ne.s32.totalorder %s2370_s11, 1 }
  0xb3   : > { %1153 = vmatpush.bf16.msra.mxu2 %v1760_v5  ;;  %v2033_v33 = vld [vmem:[%s2703_s20 + $0x2d8] sm:$0xf0]  ;;  %v1959_v34 = vld [vmem:[%s2703_s20 + $0x210] sm:$0xf]  ;;  %v2032_v37 = vor.u32 %v2246_v29, %v2031_v28  ;;  %v2221_v38 = vld [vmem:[%s2703_s20 + $0x214] sm:$0xf] }
  0xb4   : > { %1166 = vmatpush.bf16.msra.mxu3 %v1764_v6  ;;  %v2229_v35 = vld [vmem:[%s2703_s20 + $0x24c] sm:$0xf0]  ;;  %v2036_v40 = vor.u32 %v2238_v32, %v2033_v33  ;;  %v1961_v41 = vld [vmem:[%s2703_s20 + $0x250] sm:$0xf0]  ;;  %v1967_v42 = vld [vmem:[%s2703_s20 + $0x218] sm:$0xf] }
  0xb5   : > { %v2792_v39 = vld [vmem:[%s3125_s1] sm:$0xf]  ;;  %v2230_v43 = vld [vmem:[%s2703_s20 + $0x254] sm:$0xf0]  ;;  %v1960_v44 = vor.u32 %v2229_v35, %v1959_v34  ;;  %v2222_v45 = vld [vmem:[%s2703_s20 + $0x21c] sm:$0xf]  ;;  %v1964_v49 = vor.u32 %v2221_v38, %v1961_v41 }
  0xb6   : > { %1128 = vmatpush.bf16.msra.mxu0 %v1688_v16  ;;  %1141 = vmatpush.bf16.msra.mxu1 %v1692_v17  ;;  %v1969_v46 = vld [vmem:[%s2703_s20 + $0x258] sm:$0xf0]  ;;  %v1895_v47 = vld [vmem:[%s2703_s20 + $0x190] sm:$0xf]  ;;  %v1968_v50 = vor.u32 %v2230_v43, %v1967_v42  ;;  %v2205_v51 = vld [vmem:[%s2703_s20 + $0x194] sm:$0xf] }
  0xb7   : > { %1154 = vmatpush.bf16.msra.mxu2 %v1696_v19  ;;  %v2213_v48 = vld [vmem:[%s2703_s20 + $0x1cc] sm:$0xf0]  ;;  %v1972_v52 = vor.u32 %v2222_v45, %v1969_v46  ;;  %v1897_v53 = vld [vmem:[%s2703_s20 + $0x1d0] sm:$0xf0]  ;;  %v1903_v54 = vld [vmem:[%s2703_s20 + $0x198] sm:$0xf] }
  0xb8   : > { %1167 = vmatpush.bf16.msra.mxu3 %v1700_v20  ;;  %v2214_v55 = vld [vmem:[%s2703_s20 + $0x1d4] sm:$0xf0]  ;;  %v1896_v56 = vor.u32 %v2213_v48, %v1895_v47  ;;  %v2206_v57 = vld [vmem:[%s2703_s20 + $0x19c] sm:$0xf]  ;;  %v1831_v59 = vld [vmem:[%s2703_s20 + $0x110] sm:$0xf]  ;;  %v1900_v61 = vor.u32 %v2205_v51, %v1897_v53 }
  0xb9   : > { %2133 = vmatmul.msk.bf16.vlgmr.msra.gmra.mxu0 %vm1068_vm2, %v2792_v39  ;;  %2134 = vmatmul.msk.bf16.vlgmr.msra.gmra.mxu1 %vm1068_vm2, %v2792_v39  ;;  %v1905_v58 = vld [vmem:[%s2703_s20 + $0x1d8] sm:$0xf0]  ;;  %v2197_v60 = vld [vmem:[%s2703_s20 + $0x14c] sm:$0xf0]  ;;  %v1904_v62 = vor.u32 %v2214_v55, %v1903_v54  ;;  %v2189_v63 = vld [vmem:[%s2703_s20 + $0x114] sm:$0xf] }
  0xba   : > { %1174 = vmatpush.bf16.msrb.mxu0 %v1086_v21  ;;  %1187 = vmatpush.bf16.msrb.mxu1 %v1089_v24  ;;  %v1833_v0 = vld [vmem:[%s2703_s20 + $0x150] sm:$0xf0]  ;;  %v1908_v1 = vor.u32 %v2206_v57, %v1905_v58  ;;  %v1839_v2 = vld [vmem:[%s2703_s20 + $0x118] sm:$0xf]  ;;  %v2190_v4 = vld [vmem:[%s2703_s20 + $0x11c] sm:$0xf]  ;;  %v1832_v5 = vor.u32 %v2197_v60, %v1831_v59 }
  0xbb   : > { %1200 = vmatpush.bf16.msrb.mxu2 %v1092_v25  ;;  %2136 = vmatmul.msk.bf16.vlgmr.msra.gmra.mxu3 %vm1068_vm2, %v2792_v39  ;;  %v2198_v3 = vld [vmem:[%s2703_s20 + $0x154] sm:$0xf0]  ;;  %v1841_v6 = vld [vmem:[%s2703_s20 + $0x158] sm:$0xf0]  ;;  %v1767_v7 = vld [vmem:[%s2703_s20 + $0x90] sm:$0xf]  ;;  %v1836_v12 = vor.u32 %v2189_v63, %v1833_v0 }
  0xbc   : > { %1213 = vmatpush.bf16.msrb.mxu3 %v1095_v30  ;;  %2135 = vmatmul.msk.bf16.vlgmr.msra.gmra.mxu2 %vm1068_vm2, %v2792_v39  ;;  %v2181_v8 = vld [vmem:[%s2703_s20 + $0xcc] sm:$0xf0]  ;;  %v2173_v9 = vld [vmem:[%s2703_s20 + $0x94] sm:$0xf]  ;;  %v1775_v11 = vld [vmem:[%s2703_s20 + $0x98] sm:$0xf]  ;;  %v1840_v13 = vor.u32 %v2198_v3, %v1839_v2  ;;  %v1844_v17 = vor.u32 %v2190_v4, %v1841_v6 }
  0xbd   : > { %v1769_v10 = vld [vmem:[%s2703_s20 + $0xd0] sm:$0xf0]  ;;  %v2182_v14 = vld [vmem:[%s2703_s20 + $0xd4] sm:$0xf0]  ;;  %v2174_v15 = vld [vmem:[%s2703_s20 + $0x9c] sm:$0xf]  ;;  %v1768_v22 = vor.u32 %v2181_v8, %v1767_v7 }
  0xbe   : > { %1175 = vmatpush.bf16.msrb.mxu0 %v2024_v31  ;;  %1188 = vmatpush.bf16.msrb.mxu1 %v2028_v36  ;;  %v1777_v16 = vld [vmem:[%s2703_s20 + $0xd8] sm:$0xf0]  ;;  %v1703_v18 = vld [vmem:[%s2703_s20 + $0x10] sm:$0xf]  ;;  %v2103_v20 = vld [vmem:[%s2703_s20 + $0x320] sm:$0xf]  ;;  %v1772_v29 = vor.u32 %v2173_v9, %v1769_v10  ;;  %v1776_v30 = vor.u32 %v2182_v14, %v1775_v11 }
  0xbf   : > { %1201 = vmatpush.bf16.msrb.mxu2 %v2032_v37  ;;  %v2165_v19 = vld [vmem:[%s2703_s20 + $0x4c] sm:$0xf0]  ;;  %v2263_v21 = vld [vmem:[%s2703_s20 + $0x35c] sm:$0x30]  ;;  %v2255_v23 = vld [vmem:[%s2703_s20 + $0x324] sm:$0xf]  ;;  %v1780_v33 = vor.u32 %v2174_v15, %v1777_v16 }
  0xc0   : > { %1214 = vmatpush.bf16.msrb.mxu3 %v2036_v40  ;;  %v2105_v24 = vld [vmem:[%s2703_s20 + $0x360] sm:$0x30]  ;;  %v2111_v25 = vld [vmem:[%s2703_s20 + $0x328] sm:$0xf]  ;;  %v2256_v27 = vld [vmem:[%s2703_s20 + $0x32c] sm:$0xf]  ;;  %v2104_v32 = vor.u32 %v2263_v21, %v2103_v20  ;;  %v1704_v38 = vor.u32 %v2165_v19, %v1703_v18 }
  0xc1   : > { %v2264_v26 = vld [vmem:[%s2703_s20 + $0x364] sm:$0x30]  ;;  %v2113_v28 = vld [vmem:[%s2703_s20 + $0x368] sm:$0x30]  ;;  %v2157_v31 = vld [vmem:[%s2703_s20 + $0x14] sm:$0xf]  ;;  %v2108_v37 = vor.u32 %v2255_v23, %v2105_v24 }
  0xc2   : > { %1176 = vmatpush.bf16.msrb.mxu0 %v1960_v44  ;;  %1189 = vmatpush.bf16.msrb.mxu1 %v1964_v49  ;;  %v1705_v34 = vld [vmem:[%s2703_s20 + $0x50] sm:$0xf0]  ;;  %v1711_v35 = vld [vmem:[%s2703_s20 + $0x18] sm:$0xf]  ;;  %v2158_v40 = vld [vmem:[%s2703_s20 + $0x1c] sm:$0xf]  ;;  %v2112_v42 = vor.u32 %v2264_v26, %v2111_v25  ;;  %v2116_v43 = vor.u32 %v2256_v27, %v2113_v28 }
  0xc3   : > { %1202 = vmatpush.bf16.msrb.mxu2 %v1968_v50  ;;  %v2166_v36 = vld [vmem:[%s2703_s20 + $0x54] sm:$0xf0]  ;;  %v1713_v41 = vld [vmem:[%s2703_s20 + $0x58] sm:$0xf0]  ;;  %v1708_v44 = vor.u32 %v2157_v31, %v1705_v34  ;;  %v1098_v46 = vsel %vm1072_vm1, %v2104_v32, 0  ;;  %v1101_v50 = vsel %vm1072_vm1, %v2108_v37, 0 }
  0xc4   : > { %1215 = vmatpush.bf16.msrb.mxu3 %v1972_v52  ;;  %v1712_v45 = vor.u32 %v2166_v36, %v1711_v35  ;;  %v2039_v47 = vld [vmem:[%s2703_s20 + $0x2a0] sm:$0xf]  ;;  %v1716_v49 = vor.u32 %v2158_v40, %v1713_v41  ;;  %v2239_v51 = vld [vmem:[%s2703_s20 + $0x2a4] sm:$0xf]  ;;  %v1104_v52 = vsel %vm1072_vm1, %v2112_v42, 0  ;;  %v1107_v53 = vsel %vm1072_vm1, %v2116_v43, 0 }
  0xc5   : > { %v2247_v48 = vld [vmem:[%s2703_s20 + $0x2dc] sm:$0xf0]  ;;  %v2041_v54 = vld [vmem:[%s2703_s20 + $0x2e0] sm:$0xf0]  ;;  %v2047_v55 = vld [vmem:[%s2703_s20 + $0x2a8] sm:$0xf] }
  0xc6   : > { %1177 = vmatpush.bf16.msrb.mxu0 %v1896_v56  ;;  %1190 = vmatpush.bf16.msrb.mxu1 %v1900_v61  ;;  %v2040_v56 = vor.u32 %v2247_v48, %v2039_v47  ;;  %v2248_v57 = vld [vmem:[%s2703_s20 + $0x2e4] sm:$0xf0]  ;;  %v2240_v58 = vld [vmem:[%s2703_s20 + $0x2ac] sm:$0xf]  ;;  %v1975_v60 = vld [vmem:[%s2703_s20 + $0x220] sm:$0xf] }
  0xc7   : > { %1203 = vmatpush.bf16.msrb.mxu2 %v1904_v62  ;;  %v2049_v59 = vld [vmem:[%s2703_s20 + $0x2e8] sm:$0xf0]  ;;  %v2231_v61 = vld [vmem:[%s2703_s20 + $0x25c] sm:$0xf0]  ;;  %v2044_v62 = vor.u32 %v2239_v51, %v2041_v54  ;;  %v2048_v63 = vor.u32 %v2248_v57, %v2047_v55  ;;  %v1977_v2 = vld [vmem:[%s2703_s20 + $0x260] sm:$0xf0] }
  0xc8   : > { %1216 = vmatpush.bf16.msrb.mxu3 %v1908_v1  ;;  %v2052_v0 = vor.u32 %v2240_v58, %v2049_v59  ;;  %v2223_v1 = vld [vmem:[%s2703_s20 + $0x224] sm:$0xf]  ;;  %v1983_v3 = vld [vmem:[%s2703_s20 + $0x228] sm:$0xf]  ;;  %v1976_v4 = vor.u32 %v2231_v61, %v1975_v60  ;;  %v2224_v6 = vld [vmem:[%s2703_s20 + $0x22c] sm:$0xf] }
  0xc9   : > { %v1985_v7 = vld [vmem:[%s2703_s20 + $0x268] sm:$0xf0]  ;;  %v1911_v8 = vld [vmem:[%s2703_s20 + $0x1a0] sm:$0xf]  ;;  %v1980_v10 = vor.u32 %v2223_v1, %v1977_v2  ;;  %v1913_v14 = vld [vmem:[%s2703_s20 + $0x1e0] sm:$0xf0] }
  0xca   : > { %1178 = vmatpush.bf16.msrb.mxu0 %v1832_v5  ;;  %1191 = vmatpush.bf16.msrb.mxu1 %v1836_v12  ;;  %v2232_v5 = vld [vmem:[%s2703_s20 + $0x264] sm:$0xf0]  ;;  %v2215_v9 = vld [vmem:[%s2703_s20 + $0x1dc] sm:$0xf0]  ;;  %v1988_v12 = vor.u32 %v2224_v6, %v1985_v7  ;;  %v2208_v18 = vld [vmem:[%s2703_s20 + $0x1ac] sm:$0xf] }
  0xcb   : > { %1204 = vmatpush.bf16.msrb.mxu2 %v1840_v13  ;;  %v1984_v11 = vor.u32 %v2232_v5, %v1983_v3  ;;  %v2207_v13 = vld [vmem:[%s2703_s20 + $0x1a4] sm:$0xf]  ;;  %v1919_v15 = vld [vmem:[%s2703_s20 + $0x1a8] sm:$0xf]  ;;  %v1912_v16 = vor.u32 %v2215_v9, %v1911_v8  ;;  %v1921_v19 = vld [vmem:[%s2703_s20 + $0x1e8] sm:$0xf0] }
  0xcc   : > { %1217 = vmatpush.bf16.msrb.mxu3 %v1844_v17  ;;  %v2216_v17 = vld [vmem:[%s2703_s20 + $0x1e4] sm:$0xf0]  ;;  %v1847_v20 = vld [vmem:[%s2703_s20 + $0x120] sm:$0xf]  ;;  %v1924_v24 = vor.u32 %v2208_v18, %v1921_v19  ;;  %v2191_v25 = vld [vmem:[%s2703_s20 + $0x124] sm:$0xf] }
  0xcd   : > { %v2199_v21 = vld [vmem:[%s2703_s20 + $0x15c] sm:$0xf0]  ;;  %v1920_v23 = vor.u32 %v2216_v17, %v1919_v15  ;;  %v1849_v26 = vld [vmem:[%s2703_s20 + $0x160] sm:$0xf0]  ;;  %v1855_v27 = vld [vmem:[%s2703_s20 + $0x128] sm:$0xf] }
  0xce   : > { %1179 = vmatpush.bf16.msrb.mxu0 %v1768_v22  ;;  %1192 = vmatpush.bf16.msrb.mxu1 %v1772_v29  ;;  %v1916_v22 = vor.u32 %v2207_v13, %v1913_v14  ;;  %v1848_v28 = vor.u32 %v2199_v21, %v1847_v20  ;;  %v2200_v29 = vld [vmem:[%s2703_s20 + $0x164] sm:$0xf0]  ;;  %v1857_v31 = vld [vmem:[%s2703_s20 + $0x168] sm:$0xf0]  ;;  %v1783_v32 = vld [vmem:[%s2703_s20 + $0xa0] sm:$0xf]  ;;  %v1852_v35 = vor.u32 %v2191_v25, %v1849_v26 }
  0xcf   : > { %1205 = vmatpush.bf16.msrb.mxu2 %v1776_v30  ;;  %v2192_v30 = vld [vmem:[%s2703_s20 + $0x12c] sm:$0xf]  ;;  %v2175_v34 = vld [vmem:[%s2703_s20 + $0xa4] sm:$0xf]  ;;  %v1791_v37 = vld [vmem:[%s2703_s20 + $0xa8] sm:$0xf]  ;;  %v1856_v40 = vor.u32 %v2200_v29, %v1855_v27 }
  0xd0   : > { %1218 = vmatpush.bf16.msrb.mxu3 %v1780_v33  ;;  %v2183_v33 = vld [vmem:[%s2703_s20 + $0xdc] sm:$0xf0]  ;;  %v1785_v36 = vld [vmem:[%s2703_s20 + $0xe0] sm:$0xf0]  ;;  %v1860_v41 = vor.u32 %v2192_v30, %v1857_v31  ;;  %v2176_v42 = vld [vmem:[%s2703_s20 + $0xac] sm:$0xf] }
  0xd1   : > { %v2119_v43 = vld [vmem:[%s2703_s20 + $0x330] sm:$0xf]  ;;  %v1719_v47 = vld [vmem:[%s2703_s20 + $0x20] sm:$0xf]  ;;  %v2257_v51 = vld [vmem:[%s2703_s20 + $0x334] sm:$0xf] }
  0xd2   : > { %1180 = vmatpush.bf16.msrb.mxu0 %v1704_v38  ;;  %1193 = vmatpush.bf16.msrb.mxu1 %v1708_v44  ;;  %v2184_v38 = vld [vmem:[%s2703_s20 + $0xe4] sm:$0xf0]  ;;  %v2265_v44 = vld [vmem:[%s2703_s20 + $0x36c] sm:$0x30]  ;;  %v2167_v48 = vld [vmem:[%s2703_s20 + $0x5c] sm:$0xf0] }
  0xd3   : > { %1206 = vmatpush.bf16.msrb.mxu2 %v1712_v45  ;;  %v1784_v45 = vor.u32 %v2183_v33, %v1783_v32  ;;  %v2121_v54 = vld [vmem:[%s2703_s20 + $0x370] sm:$0x30]  ;;  %v2127_v55 = vld [vmem:[%s2703_s20 + $0x338] sm:$0xf]  ;;  %v1792_v57 = vor.u32 %v2184_v38, %v1791_v37  ;;  %v1727_v59 = vld [vmem:[%s2703_s20 + $0x28] sm:$0xf] }
  0xd4   : > { %1219 = vmatpush.bf16.msrb.mxu3 %v1716_v49  ;;  %v2159_v49 = vld [vmem:[%s2703_s20 + $0x24] sm:$0xf]  ;;  %v2258_v60 = vld [vmem:[%s2703_s20 + $0x33c] sm:$0xf]  ;;  %v1729_v1 = vld [vmem:[%s2703_s20 + $0x68] sm:$0xf0]  ;;  %v2124_v2 = vor.u32 %v2257_v51, %v2121_v54 }
  0xd5   : > { %2137 = vmatmul.msk.bf16.vlgmr.msrb.gmra.mxu0 %vm1068_vm2, %v2792_v39  ;;  %2138 = vmatmul.msk.bf16.vlgmr.msrb.gmra.mxu1 %vm1068_vm2, %v2792_v39  ;;  %v2129_v61 = vld [vmem:[%s2703_s20 + $0x378] sm:$0x30]  ;;  %v2055_v9 = vld [vmem:[%s2703_s20 + $0x2b0] sm:$0xf]  ;;  %v2063_v15 = vld [vmem:[%s2703_s20 + $0x2b8] sm:$0xf] }
  0xd6   : > { %1226 = vmatpush.bf16.msra.mxu0 %v1098_v46  ;;  %1239 = vmatpush.bf16.msra.mxu1 %v1101_v50  ;;  %v1793_v46 = vld [vmem:[%s2703_s20 + $0xe8] sm:$0xf0]  ;;  %v1721_v50 = vld [vmem:[%s2703_s20 + $0x60] sm:$0xf0]  ;;  %v2132_v6 = vor.u32 %v2258_v60, %v2129_v61  ;;  %v1113_v13 = vsel %vm1072_vm1, %v2124_v2, 0 }
  0xd7   : > { %1252 = vmatpush.bf16.msra.mxu2 %v1104_v52  ;;  %2140 = vmatmul.msk.bf16.vlgmr.msrb.gmra.mxu3 %vm1068_vm2, %v2792_v39  ;;  %v1788_v52 = vor.u32 %v2175_v34, %v1785_v36  ;;  %v1796_v58 = vor.u32 %v2176_v42, %v1793_v46  ;;  %v2242_v18 = vld [vmem:[%s2703_s20 + $0x2bc] sm:$0xf]  ;;  %v2225_v25 = vld [vmem:[%s2703_s20 + $0x234] sm:$0xf]  ;;  %v2234_v29 = vld [vmem:[%s2703_s20 + $0x274] sm:$0xf0] }
  0xd8   : > { %1265 = vmatpush.bf16.msra.mxu3 %v1107_v53  ;;  %2139 = vmatmul.msk.bf16.vlgmr.msrb.gmra.mxu2 %vm1068_vm2, %v2792_v39  ;;  %v2120_v53 = vor.u32 %v2265_v44, %v2119_v43  ;;  %v1119_v17 = vsel %vm1072_vm1, %v2132_v6, 0  ;;  %v2065_v19 = vld [vmem:[%s2703_s20 + $0x2f8] sm:$0xf0]  ;;  %v1993_v27 = vld [vmem:[%s2703_s20 + $0x270] sm:$0xf0] }
  0xd9   : > { %v2068_v26 = vor.u32 %v2242_v18, %v2065_v19  ;;  %v2226_v30 = vld [vmem:[%s2703_s20 + $0x23c] sm:$0xf]  ;;  %v1996_v33 = vor.u32 %v2225_v25, %v1993_v27  ;;  %v2217_v36 = vld [vmem:[%s2703_s20 + $0x1ec] sm:$0xf0]  ;;  %v2209_v37 = vld [vmem:[%s2703_s20 + $0x1b4] sm:$0xf] }
  0xda   : > { %1227 = vmatpush.bf16.msra.mxu0 %v2040_v56  ;;  %1240 = vmatpush.bf16.msra.mxu1 %v2044_v62  ;;  %v2266_v56 = vld [vmem:[%s2703_s20 + $0x374] sm:$0x30]  ;;  %v1720_v62 = vor.u32 %v2167_v48, %v1719_v47  ;;  %v1110_v5 = vsel %vm1072_vm1, %v2120_v53, 0  ;;  %v2001_v31 = vld [vmem:[%s2703_s20 + $0x278] sm:$0xf0] }
  0xdb   : > { %1253 = vmatpush.bf16.msra.mxu2 %v2048_v63  ;;  %v2168_v63 = vld [vmem:[%s2703_s20 + $0x64] sm:$0xf0]  ;;  %v2128_v3 = vor.u32 %v2266_v56, %v2127_v55  ;;  %v2004_v38 = vor.u32 %v2226_v30, %v2001_v31  ;;  %v2218_v42 = vld [vmem:[%s2703_s20 + $0x1f4] sm:$0xf0]  ;;  %v2210_v43 = vld [vmem:[%s2703_s20 + $0x1bc] sm:$0xf] }
  0xdc   : > { %1266 = vmatpush.bf16.msra.mxu3 %v2052_v0  ;;  %v2160_v0 = vld [vmem:[%s2703_s20 + $0x2c] sm:$0xf]  ;;  %v1728_v7 = vor.u32 %v2168_v63, %v1727_v59  ;;  %v1937_v44 = vld [vmem:[%s2703_s20 + $0x1f8] sm:$0xf0]  ;;  %v1863_v48 = vld [vmem:[%s2703_s20 + $0x130] sm:$0xf] }
  0xdd   : > { %v1732_v8 = vor.u32 %v2160_v0, %v1729_v1  ;;  %v1116_v14 = vsel %vm1072_vm1, %v2128_v3, 0  ;;  %v1940_v51 = vor.u32 %v2210_v43, %v1937_v44  ;;  %v1871_v53 = vld [vmem:[%s2703_s20 + $0x138] sm:$0xf]  ;;  %v2194_v55 = vld [vmem:[%s2703_s20 + $0x13c] sm:$0xf] }
  0xde   : > { %1228 = vmatpush.bf16.msra.mxu0 %v1976_v4  ;;  %1241 = vmatpush.bf16.msra.mxu1 %v1980_v10  ;;  %v1724_v4 = vor.u32 %v2159_v49, %v1721_v50  ;;  %v2249_v10 = vld [vmem:[%s2703_s20 + $0x2ec] sm:$0xf0]  ;;  %v2193_v50 = vld [vmem:[%s2703_s20 + $0x134] sm:$0xf]  ;;  %v2202_v54 = vld [vmem:[%s2703_s20 + $0x174] sm:$0xf0] }
  0xdf   : > { %1254 = vmatpush.bf16.msra.mxu2 %v1984_v11  ;;  %v2241_v11 = vld [vmem:[%s2703_s20 + $0x2b4] sm:$0xf]  ;;  %v2056_v20 = vor.u32 %v2249_v10, %v2055_v9  ;;  %v2201_v49 = vld [vmem:[%s2703_s20 + $0x16c] sm:$0xf0]  ;;  %v1873_v56 = vld [vmem:[%s2703_s20 + $0x178] sm:$0xf0]  ;;  %v1872_v59 = vor.u32 %v2202_v54, %v1871_v53 }
  0xe0   : > { %1267 = vmatpush.bf16.msra.mxu3 %v1988_v12  ;;  %v2057_v12 = vld [vmem:[%s2703_s20 + $0x2f0] sm:$0xf0]  ;;  %v1799_v60 = vld [vmem:[%s2703_s20 + $0xb0] sm:$0xf]  ;;  %v1876_v63 = vor.u32 %v2194_v55, %v1873_v56  ;;  %v1807_v1 = vld [vmem:[%s2703_s20 + $0xb8] sm:$0xf] }
  0xe1   : > { %v2060_v21 = vor.u32 %v2241_v11, %v2057_v12  ;;  %v2185_v61 = vld [vmem:[%s2703_s20 + $0xec] sm:$0xf0]  ;;  %v1801_v0 = vld [vmem:[%s2703_s20 + $0xf0] sm:$0xf0]  ;;  %v2186_v2 = vld [vmem:[%s2703_s20 + $0xf4] sm:$0xf0] }
  0xe2   : > { %1229 = vmatpush.bf16.msra.mxu0 %v1912_v16  ;;  %1242 = vmatpush.bf16.msra.mxu1 %v1916_v22  ;;  %v2250_v16 = vld [vmem:[%s2703_s20 + $0x2f4] sm:$0xf0]  ;;  %v2178_v3 = vld [vmem:[%s2703_s20 + $0xbc] sm:$0xf]  ;;  %v2169_v9 = vld [vmem:[%s2703_s20 + $0x6c] sm:$0xf0] }
  0xe3   : > { %1255 = vmatpush.bf16.msra.mxu2 %v1920_v23  ;;  %v2064_v22 = vor.u32 %v2250_v16, %v2063_v15  ;;  %v1991_v23 = vld [vmem:[%s2703_s20 + $0x230] sm:$0xf]  ;;  %v2161_v10 = vld [vmem:[%s2703_s20 + $0x34] sm:$0xf]  ;;  %v2162_v15 = vld [vmem:[%s2703_s20 + $0x3c] sm:$0xf] }
  0xe4   : > { %1268 = vmatpush.bf16.msra.mxu3 %v1924_v24  ;;  %v2233_v24 = vld [vmem:[%s2703_s20 + $0x26c] sm:$0xf0]  ;;  %v1737_v12 = vld [vmem:[%s2703_s20 + $0x70] sm:$0xf0]  ;;  %v1745_v16 = vld [vmem:[%s2703_s20 + $0x78] sm:$0xf0] }
  0xe5   : > { %v1992_v32 = vor.u32 %v2233_v24, %v1991_v23  ;;  %v1740_v18 = vor.u32 %v2161_v10, %v1737_v12 }
  0xe6   : > { %1230 = vmatpush.bf16.msra.mxu0 %v1848_v28  ;;  %1243 = vmatpush.bf16.msra.mxu1 %v1852_v35  ;;  %v1999_v28 = vld [vmem:[%s2703_s20 + $0x238] sm:$0xf]  ;;  %v1927_v35 = vld [vmem:[%s2703_s20 + $0x1b0] sm:$0xf] }
  0xe7   : > { %1256 = vmatpush.bf16.msra.mxu2 %v1856_v40  ;;  %v2000_v34 = vor.u32 %v2234_v29, %v1999_v28  ;;  %v1929_v40 = vld [vmem:[%s2703_s20 + $0x1f0] sm:$0xf0] }
  0xe8   : > { %1269 = vmatpush.bf16.msra.mxu3 %v1860_v41  ;;  %v1935_v41 = vld [vmem:[%s2703_s20 + $0x1b8] sm:$0xf]  ;;  %v1932_v46 = vor.u32 %v2209_v37, %v1929_v40 }
  0xe9   : > { %v1936_v47 = vor.u32 %v2218_v42, %v1935_v41 }
  0xea   : > { %1231 = vmatpush.bf16.msra.mxu0 %v1784_v45  ;;  %1244 = vmatpush.bf16.msra.mxu1 %v1788_v52  ;;  %v1928_v45 = vor.u32 %v2217_v36, %v1927_v35  ;;  %v1865_v52 = vld [vmem:[%s2703_s20 + $0x170] sm:$0xf0] }
  0xeb   : > { %1257 = vmatpush.bf16.msra.mxu2 %v1792_v57  ;;  %v1864_v57 = vor.u32 %v2201_v49, %v1863_v48 }
  0xec   : > { %1270 = vmatpush.bf16.msra.mxu3 %v1796_v58  ;;  %v1868_v58 = vor.u32 %v2193_v50, %v1865_v52 }
  0xee   : > { %1232 = vmatpush.bf16.msra.mxu0 %v1720_v62  ;;  %1245 = vmatpush.bf16.msra.mxu1 %v1724_v4  ;;  %v2177_v62 = vld [vmem:[%s2703_s20 + $0xb4] sm:$0xf]  ;;  %v1809_v4 = vld [vmem:[%s2703_s20 + $0xf8] sm:$0xf0] }
  0xef   : > { %1258 = vmatpush.bf16.msra.mxu2 %v1728_v7  ;;  %v1804_v6 = vor.u32 %v2177_v62, %v1801_v0  ;;  %v1808_v7 = vor.u32 %v2186_v2, %v1807_v1  ;;  %v1812_v11 = vor.u32 %v2178_v3, %v1809_v4 }
  0xf0   : > { %1271 = vmatpush.bf16.msra.mxu3 %v1732_v8  ;;  %v1735_v8 = vld [vmem:[%s2703_s20 + $0x30] sm:$0xf] }
  0xf1   : > { %2141 = vmatmul.msk.bf16.vlgmr.msra.gmra.mxu0 %vm1068_vm2, %v2792_v39  ;;  %2142 = vmatmul.msk.bf16.vlgmr.msra.gmra.mxu1 %vm1068_vm2, %v2792_v39 }
  0xf2   : > { %1278 = vmatpush.bf16.msrb.mxu0 %v1110_v5  ;;  %1291 = vmatpush.bf16.msrb.mxu1 %v1113_v13  ;;  %v1800_v5 = vor.u32 %v2185_v61, %v1799_v60  ;;  %v1743_v13 = vld [vmem:[%s2703_s20 + $0x38] sm:$0xf] }
  0xf3   : > { %1304 = vmatpush.bf16.msrb.mxu2 %v1116_v14  ;;  %2144 = vmatmul.msk.bf16.vlgmr.msra.gmra.mxu3 %vm1068_vm2, %v2792_v39  ;;  %v2170_v14 = vld [vmem:[%s2703_s20 + $0x74] sm:$0xf0] }
  0xf4   : > { %1317 = vmatpush.bf16.msrb.mxu3 %v1119_v17  ;;  %2143 = vmatmul.msk.bf16.vlgmr.msra.gmra.mxu2 %vm1068_vm2, %v2792_v39  ;;  %v1736_v17 = vor.u32 %v2169_v9, %v1735_v8  ;;  %v1744_v19 = vor.u32 %v2170_v14, %v1743_v13 }
  0xf6   : > { %1279 = vmatpush.bf16.msrb.mxu0 %v2056_v20  ;;  %1292 = vmatpush.bf16.msrb.mxu1 %v2060_v21  ;;  %v1748_v20 = vor.u32 %v2162_v15, %v1745_v16 }
  0xf7   : > { %1305 = vmatpush.bf16.msrb.mxu2 %v2064_v22 }
  0xf8   : > { %1318 = vmatpush.bf16.msrb.mxu3 %v2068_v26 }
  0xfa   : > { %1280 = vmatpush.bf16.msrb.mxu0 %v1992_v32  ;;  %1293 = vmatpush.bf16.msrb.mxu1 %v1996_v33 }
  0xfb   : > { %1306 = vmatpush.bf16.msrb.mxu2 %v2000_v34 }
  0xfc   : > { %1319 = vmatpush.bf16.msrb.mxu3 %v2004_v38 }
  0xfe   : > { %1281 = vmatpush.bf16.msrb.mxu0 %v1928_v45  ;;  %1294 = vmatpush.bf16.msrb.mxu1 %v1932_v46 }
  0xff   : > { %1307 = vmatpush.bf16.msrb.mxu2 %v1936_v47 }
 0x100   : > { %1320 = vmatpush.bf16.msrb.mxu3 %v1940_v51 }
 0x102   : > { %1282 = vmatpush.bf16.msrb.mxu0 %v1864_v57  ;;  %1295 = vmatpush.bf16.msrb.mxu1 %v1868_v58 }
 0x103   : > { %1308 = vmatpush.bf16.msrb.mxu2 %v1872_v59 }
 0x104   : > { %1321 = vmatpush.bf16.msrb.mxu3 %v1876_v63 }
 0x106   : > { %1283 = vmatpush.bf16.msrb.mxu0 %v1800_v5  ;;  %1296 = vmatpush.bf16.msrb.mxu1 %v1804_v6 }
 0x107   : > { %1309 = vmatpush.bf16.msrb.mxu2 %v1808_v7 }
 0x108   : > { %1322 = vmatpush.bf16.msrb.mxu3 %v1812_v11 }
 0x10a   : > { %1284 = vmatpush.bf16.msrb.mxu0 %v1736_v17  ;;  %1297 = vmatpush.bf16.msrb.mxu1 %v1740_v18 }
 0x10b   : > { %1310 = vmatpush.bf16.msrb.mxu2 %v1744_v19 }
 0x10c   : > { %1323 = vmatpush.bf16.msrb.mxu3 %v1748_v20 }
 0x10d   : > { %2145 = vmatmul.msk.bf16.vlgmr.msrb.gmra.mxu0 %vm1068_vm2, %v2792_v39  ;;  %2146 = vmatmul.msk.bf16.vlgmr.msrb.gmra.mxu1 %vm1068_vm2, %v2792_v39 }
 0x10e   : > { %2147 = vmatmul.msk.bf16.vlgmr.msrb.gmra.mxu2 %vm1068_vm2, %v2792_v39 }
 0x10f   : > { %2148 = vmatmul.msk.bf16.vlgmr.msrb.gmra.mxu3 %vm1068_vm2, %v2792_v39 }
 0x136   : > { %v1130_v21 = vpop.f32.mrf.mxu0  ;;  %v1143_v22 = vpop.f32.mrf.mxu1 }
 0x137   : > { %1332 = vst [vmem:[%s2984_s23] sm:$0xff] %v1130_v21  ;;  %v1349_v34 = vadd.f32 %v1143_v22, %v1130_v21  ;;  %v1370_v37 = vmul.f32 %v1130_v21, %v1130_v21  ;;  %v1371_v38 = vmul.f32 %v1143_v22, %v1143_v22 }
 0x138   : > { %1333 = vst [vmem:[%s2984_s23 + $0x8] sm:$0xff] %v1143_v22 }
 0x139   : > { %v1386_v41 = vadd.f32 %v1371_v38, %v1370_v37  ;;  %v1369_v37 = vld [vmem:[#allocation4] sm:$0xff] }
 0x13e   : > { %v1169_v24 = vpop.f32.mrf.mxu3  ;;  %v1132_v25 = vpop.f32.mrf.mxu0 }
 0x13f   : > { %v1156_v23 = vpop.f32.mrf.mxu2  ;;  %1335 = vst [vmem:[%s2984_s23 + $0x18] sm:$0xff] %v1169_v24  ;;  %v1145_v39 = vpop.f32.mrf.mxu1  ;;  %v1373_v45 = vmul.f32 %v1169_v24, %v1169_v24 }
 0x140   : > { %1334 = vst [vmem:[%s2984_s23 + $0x10] sm:$0xff] %v1156_v23  ;;  %v1350_v40 = vadd.f32 %v1349_v34, %v1156_v23  ;;  %v1372_v42 = vmul.f32 %v1156_v23, %v1156_v23  ;;  %v1348_v34 = vld [vmem:[#allocation3] sm:$0xff] }
 0x142   : > { %v1351_v43 = vadd.f32 %v1350_v40, %v1169_v24  ;;  %v1387_v44 = vadd.f32 %v1386_v41, %v1372_v42 }
 0x144   : > { %v1388_v49 = vadd.f32 %v1387_v44, %v1373_v45 }
 0x146   : > { %v1171_v27 = vpop.f32.mrf.mxu3 }
 0x147   : > { %v1158_v26 = vpop.f32.mrf.mxu2 }
 0x152   : > { %v1182_v28 = vpop.f32.mrf.mxu0  ;;  %v1195_v29 = vpop.f32.mrf.mxu1 }
 0x153   : > { %1336 = vst [vmem:[%s2984_s23 + $0x20] sm:$0xff] %v1182_v28  ;;  %v1352_v47 = vadd.f32 %v1351_v43, %v1182_v28  ;;  %v1374_v50 = vmul.f32 %v1182_v28, %v1182_v28  ;;  %v1375_v53 = vmul.f32 %v1195_v29, %v1195_v29 }
 0x154   : > { %1337 = vst [vmem:[%s2984_s23 + $0x28] sm:$0xff] %v1195_v29 }
 0x155   : > { %v1353_v51 = vadd.f32 %v1352_v47, %v1195_v29  ;;  %v1389_v52 = vadd.f32 %v1388_v49, %v1374_v50 }
 0x157   : > { %v1390_v59 = vadd.f32 %v1389_v52, %v1375_v53 }
 0x15a   : > { %v1221_v31 = vpop.f32.mrf.mxu3  ;;  %v1184_v32 = vpop.f32.mrf.mxu0 }
 0x15b   : > { %v1208_v30 = vpop.f32.mrf.mxu2  ;;  %1339 = vst [vmem:[%s2984_s23 + $0x38] sm:$0xff] %v1221_v31  ;;  %v1197_v33 = vpop.f32.mrf.mxu1  ;;  %v1377_v63 = vmul.f32 %v1221_v31, %v1221_v31 }
 0x15c   : > { %1338 = vst [vmem:[%s2984_s23 + $0x30] sm:$0xff] %v1208_v30  ;;  %v1354_v57 = vadd.f32 %v1353_v51, %v1208_v30  ;;  %v1376_v60 = vmul.f32 %v1208_v30, %v1208_v30 }
 0x15e   : > { %v1355_v61 = vadd.f32 %v1354_v57, %v1221_v31  ;;  %v1391_v62 = vadd.f32 %v1390_v59, %v1376_v60 }
 0x160   : > { %v1392_v4 = vadd.f32 %v1391_v62, %v1377_v63 }
 0x162   : > { %v1223_v36 = vpop.f32.mrf.mxu3 }
 0x163   : > { %v1210_v35 = vpop.f32.mrf.mxu2 }
 0x16e   : > { %v1234_v46 = vpop.f32.mrf.mxu0  ;;  %v1247_v48 = vpop.f32.mrf.mxu1 }
 0x16f   : > { %1340 = vst [vmem:[%s2984_s23 + $0x40] sm:$0xff] %v1234_v46  ;;  %v1356_v0 = vadd.f32 %v1355_v61, %v1234_v46  ;;  %v1378_v3 = vmul.f32 %v1234_v46, %v1234_v46  ;;  %v1379_v7 = vmul.f32 %v1247_v48, %v1247_v48 }
 0x170   : > { %1341 = vst [vmem:[%s2984_s23 + $0x48] sm:$0xff] %v1247_v48 }
 0x171   : > { %v1357_v5 = vadd.f32 %v1356_v0, %v1247_v48  ;;  %v1393_v6 = vadd.f32 %v1392_v4, %v1378_v3 }
 0x173   : > { %v1394_v10 = vadd.f32 %v1393_v6, %v1379_v7 }
 0x176   : > { %v1273_v55 = vpop.f32.mrf.mxu3  ;;  %v1236_v56 = vpop.f32.mrf.mxu0 }
 0x177   : > { %v1260_v54 = vpop.f32.mrf.mxu2  ;;  %1343 = vst [vmem:[%s2984_s23 + $0x58] sm:$0xff] %v1273_v55  ;;  %v1249_v58 = vpop.f32.mrf.mxu1  ;;  %v1381_v15 = vmul.f32 %v1273_v55, %v1273_v55 }
 0x178   : > { %1342 = vst [vmem:[%s2984_s23 + $0x50] sm:$0xff] %v1260_v54  ;;  %v1358_v8 = vadd.f32 %v1357_v5, %v1260_v54  ;;  %v1380_v9 = vmul.f32 %v1260_v54, %v1260_v54 }
 0x17a   : > { %v1359_v11 = vadd.f32 %v1358_v8, %v1273_v55  ;;  %v1395_v14 = vadd.f32 %v1394_v10, %v1380_v9 }
 0x17c   : > { %v1396_v18 = vadd.f32 %v1395_v14, %v1381_v15 }
 0x17e   : > { %v1275_v2 = vpop.f32.mrf.mxu3 }
 0x17f   : > { %v1262_v1 = vpop.f32.mrf.mxu2 }
 0x18a   : > { %v1286_v12 = vpop.f32.mrf.mxu0  ;;  %v1299_v13 = vpop.f32.mrf.mxu1 }
 0x18b   : > { %1344 = vst [vmem:[%s2984_s23 + $0x60] sm:$0xff] %v1286_v12  ;;  %v1360_v16 = vadd.f32 %v1359_v11, %v1286_v12  ;;  %v1382_v17 = vmul.f32 %v1286_v12, %v1286_v12  ;;  %v1383_v22 = vmul.f32 %v1299_v13, %v1299_v13 }
 0x18c   : > { %1345 = vst [vmem:[%s2984_s23 + $0x68] sm:$0xff] %v1299_v13 }
 0x18d   : > { %v1361_v19 = vadd.f32 %v1360_v16, %v1299_v13  ;;  %v1397_v21 = vadd.f32 %v1396_v18, %v1382_v17 }
 0x18f   : > { %v1398_v28 = vadd.f32 %v1397_v21, %v1383_v22 }
 0x191   : > { %v1312_v20 = vpop.f32.mrf.mxu2 }
 0x192   : > { %1346 = vst [vmem:[%s2984_s23 + $0x70] sm:$0xff] %v1312_v20  ;;  %v1325_v23 = vpop.f32.mrf.mxu3  ;;  %v1288_v24 = vpop.f32.mrf.mxu0  ;;  %v1362_v25 = vadd.f32 %v1361_v19, %v1312_v20  ;;  %v1384_v26 = vmul.f32 %v1312_v20, %v1312_v20 }
 0x193   : > { %1347 = vst [vmem:[%s2984_s23 + $0x78] sm:$0xff] %v1325_v23  ;;  %v1301_v39 = vpop.f32.mrf.mxu1  ;;  %v1385_v29 = vmul.f32 %v1325_v23, %v1325_v23 }
 0x194   : > { %v1363_v27 = vadd.f32 %v1362_v25, %v1325_v23  ;;  %v1399_v30 = vadd.f32 %v1398_v28, %v1384_v26 }
 0x196   : > { %1364 = vadd.xlane.f32.xlu0 %v1363_v27  ;;  %v1400_v33 = vadd.f32 %v1399_v30, %v1385_v29 }
 0x199   : > { %v1314_v31 = vpop.f32.mrf.mxu2 }
 0x19a   : > { %v1327_v32 = vpop.f32.mrf.mxu3 }
 0x19e   : > { %1401 = vadd.xlane.f32.xlu0 %v1400_v33 }
 0x209   : > { %v1365_v35 = vpop.xlane.xlu0 %1364 }
 0x20a   : > { %v1366_v36 = vadd.f32 %v1365_v35, %v1348_v34 }
 0x20c   : > { %1368 = vst.msk [vmem:[#allocation3] sm:$0xff] %vm1367_vm3, %v1366_v36 }
 0x210   : > { %1408 = sbr.rel (%p2151_p12) target bundleno = 717 (0x2cd), region = 59 }
 0x211   : > { %v1402_v38 = vpop.xlane.xlu0 %1401 }
 0x212   : > { %v1403_v40 = vadd.f32 %v1402_v38, %v1369_v37 }
 0x214   : > { %1404 = vst.msk [vmem:[#allocation4] sm:$0xff] %vm1367_vm3, %v1403_v40 }
 0x215   : > { %v1409_v41 = vld [vmem:[#allocation3] sm:$0xff]  ;;  %v2389_v43 = vmov 0   ;;  %v1428_v59 = vld [vmem:[#allocation2 + $0x8] sm:$0xff]  ;;  %v1429_v60 = vld [vmem:[#allocation2 + $0x10] sm:$0xff] }
 0x216   : > { %2329 = vset.pattern.permute.xlu0 %v2389_v43  ;;  %v1410_v44 = vmul.f32 0.00024414063, %v1409_v41  ;;  %v1427_v58 = vld [vmem:[#allocation2] sm:$0xff]  ;;  %v1430_v61 = vld [vmem:[#allocation2 + $0x18] sm:$0xff]  ;;  %v1432_v63 = vld [vmem:[#allocation2 + $0x28] sm:$0xff] }
 0x217   : > { %v1431_v62 = vld [vmem:[#allocation2 + $0x20] sm:$0xff]  ;;  %v1433_v3 = vld [vmem:[#allocation2 + $0x30] sm:$0xff]  ;;  %v1434_v6 = vld [vmem:[#allocation2 + $0x38] sm:$0xff] }
 0x218   : > { %1445 = vperm.xlu0 %2329, %v1410_v44   ;;  %v1413_v46 = vmul.f32 %v1410_v44, %v1410_v44  ;;  %v1435_v7 = vld [vmem:[#allocation2 + $0x40] sm:$0xff]  ;;  %v1436_v14 = vld [vmem:[#allocation2 + $0x48] sm:$0xff]  ;;  %v1437_v17 = vld [vmem:[#allocation2 + $0x50] sm:$0xff] }
 0x219   : > { %v1438_v21 = vld [vmem:[#allocation2 + $0x58] sm:$0xff]  ;;  %v1439_v39 = vld [vmem:[#allocation2 + $0x60] sm:$0xff]  ;;  %v1440_v29 = vld [vmem:[#allocation2 + $0x68] sm:$0xff] }
 0x21a   : > { %v1441_v33 = vld [vmem:[#allocation2 + $0x70] sm:$0xff]  ;;  %v1442_v37 = vld [vmem:[#allocation2 + $0x78] sm:$0xff]  ;;  %v1518_v43 = vld [vmem:[#allocation2 + $0x80] sm:$0xff] }
 0x21b   : > { %v1411_v42 = vld [vmem:[#allocation4] sm:$0xff] }
 0x21c   : > { %v1412_v45 = vmul.f32 0.00024414063, %v1411_v42 }
 0x21e   : > { %v1414_v47 = vsub.f32 %v1412_v45, %v1413_v46 }
 0x220   : > { %v1415_v48 = vmax.f32 %v1414_v47, 0.0  ;;  %v1519_v47 = vld [vmem:[#allocation2 + $0x88] sm:$0xff] }
 0x222   : > { %v1416_v49 = vadd.f32 1e-05, %v1415_v48 }
 0x224   : > { %2330 = vrsqrt.f32 %v1416_v49  ;;  %vm1423_vm4 = vweird.f32 %v1416_v49 }
 0x22a   : > { %v2331_v50 = vpop.eup %2330 }
 0x22b   : > { %v1418_v51 = vmul.f32 %v2331_v50, %v1416_v49  ;;  %vm1424_vm5 = vweird.f32 %v2331_v50 }
 0x22c   : > { %vm1425_vm6 = vmor %vm1423_vm4, %vm1424_vm5 }
 0x22d   : > { %v1419_v52 = vmul.f32 %v2331_v50, %v1418_v51  ;;  %v1520_v51 = vld [vmem:[#allocation2 + $0x90] sm:$0xff] }
 0x22f   : > { %v1420_v53 = vmul.f32 0.5, %v1419_v52 }
 0x231   : > { %v1421_v54 = vsub.f32 1.5, %v1420_v53 }
 0x233   : > { %v1422_v55 = vmul.f32 %v2331_v50, %v1421_v54  ;;  %v1521_v54 = vld [vmem:[#allocation2 + $0x98] sm:$0xff] }
 0x235   : > { %v1426_v56 = vsel %vm1425_vm6, %v2331_v50, %v1422_v55 }
 0x236   : > { %1466 = vperm.xlu0 %2329, %v1426_v56  }
 0x28a   : > { %v3003_v57 = vpop.permute.xlu0 %1445 }
 0x28b   : > { %v1448_v0 = vsub.f32 %v1427_v58, %v3003_v57  ;;  %v1449_v1 = vsub.f32 %v1428_v59, %v3003_v57  ;;  %v1450_v2 = vsub.f32 %v1429_v60, %v3003_v57  ;;  %v1451_v4 = vsub.f32 %v1430_v61, %v3003_v57  ;;  %v1522_v59 = vld [vmem:[#allocation2 + $0xa0] sm:$0xff] }
 0x28c   : > { %v1452_v8 = vsub.f32 %v1431_v62, %v3003_v57  ;;  %v1453_v12 = vsub.f32 %v1432_v63, %v3003_v57  ;;  %v1454_v15 = vsub.f32 %v1433_v3, %v3003_v57  ;;  %v1455_v18 = vsub.f32 %v1434_v6, %v3003_v57  ;;  %v1523_v63 = vld [vmem:[#allocation2 + $0xa8] sm:$0xff]  ;;  %v1524_v3 = vld [vmem:[#allocation2 + $0xb0] sm:$0xff] }
 0x28d   : > { %v1456_v19 = vsub.f32 %v1435_v7, %v3003_v57  ;;  %v1457_v26 = vsub.f32 %v1436_v14, %v3003_v57  ;;  %v1458_v30 = vsub.f32 %v1437_v17, %v3003_v57  ;;  %v1459_v34 = vsub.f32 %v1438_v21, %v3003_v57 }
 0x28e   : > { %v1460_v38 = vsub.f32 %v1439_v39, %v3003_v57  ;;  %v1461_v42 = vsub.f32 %v1440_v29, %v3003_v57  ;;  %v1462_v46 = vsub.f32 %v1441_v33, %v3003_v57  ;;  %v1463_v50 = vsub.f32 %v1442_v37, %v3003_v57 }
 0x28f   : > { %v1534_v55 = vsub.f32 %v1518_v43, %v3003_v57  ;;  %v1535_v60 = vsub.f32 %v1519_v47, %v3003_v57  ;;  %v1540_v17 = vsub.f32 %v1524_v3, %v3003_v57 }
 0x2a8   : > { %v3009_v5 = vpop.permute.xlu0 %1466 }
 0x2a9   : > { %v1469_v9 = vmul.f32 %v3009_v5, %v1448_v0  ;;  %v1470_v10 = vmul.f32 %v3009_v5, %v1449_v1  ;;  %v1471_v11 = vmul.f32 %v3009_v5, %v1450_v2  ;;  %v1472_v13 = vmul.f32 %v3009_v5, %v1451_v4 }
 0x2aa   : > { %v1473_v16 = vmul.f32 %v3009_v5, %v1452_v8  ;;  %v1474_v20 = vmul.f32 %v3009_v5, %v1453_v12  ;;  %v1475_v22 = vmul.f32 %v3009_v5, %v1454_v15  ;;  %v1476_v27 = vmul.f32 %v3009_v5, %v1455_v18  ;;  %v1525_v8 = vld [vmem:[#allocation2 + $0xb8] sm:$0xff]  ;;  %v1526_v12 = vld [vmem:[#allocation2 + $0xc0] sm:$0xff] }
 0x2ab   : > { %v1485_v23 = vmax.f32 %v1469_v9, 0.0  ;;  %v1486_v24 = vmax.f32 %v1470_v10, 0.0  ;;  %v1487_v25 = vmax.f32 %v1471_v11, 0.0  ;;  %v1488_v28 = vmax.f32 %v1472_v13, 0.0 }
 0x2ac   : > { %v1477_v31 = vmul.f32 %v3009_v5, %v1456_v19  ;;  %v1489_v32 = vmax.f32 %v1473_v16, 0.0  ;;  %v1478_v35 = vmul.f32 %v3009_v5, %v1457_v26  ;;  %v1490_v36 = vmax.f32 %v1474_v20, 0.0  ;;  %v1527_v16 = vld [vmem:[#allocation2 + $0xc8] sm:$0xff]  ;;  %v1528_v20 = vld [vmem:[#allocation2 + $0xd0] sm:$0xff] }
 0x2ad   : > { %1501 = vst [vmem:[%s2701_s19] sm:$0xff] %v1485_v23  ;;  %v1479_v40 = vmul.f32 %v3009_v5, %v1458_v30  ;;  %v1491_v41 = vmax.f32 %v1475_v22, 0.0  ;;  %v1480_v44 = vmul.f32 %v3009_v5, %v1459_v34  ;;  %v1492_v45 = vmax.f32 %v1476_v27, 0.0  ;;  %v1530_v27 = vld [vmem:[#allocation2 + $0xe0] sm:$0xff] }
 0x2ae   : > { %1502 = vst [vmem:[%s2701_s19 + $0x8] sm:$0xff] %v1486_v24  ;;  %v1481_v48 = vmul.f32 %v3009_v5, %v1460_v38  ;;  %v1493_v49 = vmax.f32 %v1477_v31, 0.0  ;;  %v1482_v52 = vmul.f32 %v3009_v5, %v1461_v42  ;;  %v1494_v53 = vmax.f32 %v1478_v35, 0.0  ;;  %v1529_v24 = vld [vmem:[#allocation2 + $0xd8] sm:$0xff]  ;;  %v1531_v31 = vld [vmem:[#allocation2 + $0xe8] sm:$0xff]  ;;  %v1532_v35 = vld [vmem:[#allocation2 + $0xf0] sm:$0xff] }
 0x2af   : > { %1503 = vst [vmem:[%s2701_s19 + $0x10] sm:$0xff] %v1487_v25  ;;  %v1483_v56 = vmul.f32 %v3009_v5, %v1462_v46  ;;  %v1495_v58 = vmax.f32 %v1479_v40, 0.0  ;;  %v1484_v61 = vmul.f32 %v3009_v5, %v1463_v50  ;;  %v1496_v62 = vmax.f32 %v1480_v44, 0.0  ;;  %v1533_v40 = vld [vmem:[#allocation2 + $0xf8] sm:$0xff] }
 0x2b0   : > { %1504 = vst [vmem:[%s2701_s19 + $0x18] sm:$0xff] %v1488_v28  ;;  %v1536_v0 = vsub.f32 %v1520_v51, %v3003_v57  ;;  %v1497_v1 = vmax.f32 %v1481_v48, 0.0  ;;  %v1550_v2 = vmul.f32 %v1534_v55, %v3009_v5  ;;  %v1537_v4 = vsub.f32 %v1521_v54, %v3003_v57 }
 0x2b1   : > { %1505 = vst [vmem:[%s2701_s19 + $0x20] sm:$0xff] %v1489_v32  ;;  %v1498_v6 = vmax.f32 %v1482_v52, 0.0  ;;  %v1551_v7 = vmul.f32 %v1535_v60, %v3009_v5  ;;  %v1538_v9 = vsub.f32 %v1522_v59, %v3003_v57  ;;  %v1499_v10 = vmax.f32 %v1483_v56, 0.0 }
 0x2b2   : > { %1506 = vst [vmem:[%s2701_s19 + $0x28] sm:$0xff] %v1490_v36  ;;  %v1552_v11 = vmul.f32 %v1536_v0, %v3009_v5  ;;  %v1539_v13 = vsub.f32 %v1523_v63, %v3003_v57  ;;  %v1500_v14 = vmax.f32 %v1484_v61, 0.0  ;;  %v1553_v15 = vmul.f32 %v1537_v4, %v3009_v5 }
 0x2b3   : > { %1507 = vst [vmem:[%s2701_s19 + $0x30] sm:$0xff] %v1491_v41  ;;  %v1554_v18 = vmul.f32 %v1538_v9, %v3009_v5  ;;  %v1566_v19 = vmax.f32 %v1550_v2, 0.0  ;;  %v1541_v21 = vsub.f32 %v1525_v8, %v3003_v57  ;;  %v1567_v23 = vmax.f32 %v1551_v7, 0.0 }
 0x2b4   : > { %1508 = vst [vmem:[%s2701_s19 + $0x38] sm:$0xff] %v1492_v45  ;;  %v1555_v22 = vmul.f32 %v1539_v13, %v3009_v5  ;;  %v1542_v25 = vsub.f32 %v1526_v12, %v3003_v57  ;;  %v1556_v39 = vmul.f32 %v1540_v17, %v3009_v5  ;;  %v1568_v26 = vmax.f32 %v1552_v11, 0.0 }
 0x2b5   : > { %1509 = vst [vmem:[%s2701_s19 + $0x40] sm:$0xff] %v1493_v49  ;;  %v1543_v28 = vsub.f32 %v1527_v16, %v3003_v57  ;;  %v1557_v29 = vmul.f32 %v1541_v21, %v3009_v5  ;;  %v1569_v30 = vmax.f32 %v1553_v15, 0.0  ;;  %v1544_v32 = vsub.f32 %v1528_v20, %v3003_v57 }
 0x2b6   : > { %1510 = vst [vmem:[%s2701_s19 + $0x48] sm:$0xff] %v1494_v53  ;;  %v1558_v33 = vmul.f32 %v1542_v25, %v3009_v5  ;;  %v1570_v34 = vmax.f32 %v1554_v18, 0.0  ;;  %v1545_v36 = vsub.f32 %v1529_v24, %v3003_v57  ;;  %v1571_v38 = vmax.f32 %v1555_v22, 0.0 }
 0x2b7   : > { %1511 = vst [vmem:[%s2701_s19 + $0x50] sm:$0xff] %v1495_v58  ;;  %v1559_v37 = vmul.f32 %v1543_v28, %v3009_v5  ;;  %v1546_v41 = vsub.f32 %v1530_v27, %v3003_v57  ;;  %v1560_v42 = vmul.f32 %v1544_v32, %v3009_v5  ;;  %v1572_v43 = vmax.f32 %v1556_v39, 0.0 }
 0x2b8   : > { %1512 = vst [vmem:[%s2701_s19 + $0x58] sm:$0xff] %v1496_v62  ;;  %v1547_v44 = vsub.f32 %v1531_v31, %v3003_v57  ;;  %v1561_v45 = vmul.f32 %v1545_v36, %v3009_v5  ;;  %v1573_v46 = vmax.f32 %v1557_v29, 0.0  ;;  %v1548_v47 = vsub.f32 %v1532_v35, %v3003_v57 }
 0x2b9   : > { %1513 = vst [vmem:[%s2701_s19 + $0x60] sm:$0xff] %v1497_v1  ;;  %v1562_v48 = vmul.f32 %v1546_v41, %v3009_v5  ;;  %v1574_v49 = vmax.f32 %v1558_v33, 0.0  ;;  %v1549_v50 = vsub.f32 %v1533_v40, %v3003_v57  ;;  %v1575_v52 = vmax.f32 %v1559_v37, 0.0 }
 0x2ba   : > { %1514 = vst [vmem:[%s2701_s19 + $0x68] sm:$0xff] %v1498_v6  ;;  %v1563_v51 = vmul.f32 %v1547_v44, %v3009_v5  ;;  %v1564_v53 = vmul.f32 %v1548_v47, %v3009_v5  ;;  %v1576_v54 = vmax.f32 %v1560_v42, 0.0  ;;  %v1577_v56 = vmax.f32 %v1561_v45, 0.0 }
 0x2bb   : > { %1515 = vst [vmem:[%s2701_s19 + $0x70] sm:$0xff] %v1499_v10  ;;  %v1565_v55 = vmul.f32 %v1549_v50, %v3009_v5  ;;  %v1578_v58 = vmax.f32 %v1562_v48, 0.0 }
 0x2bc   : > { %1516 = vst [vmem:[%s2701_s19 + $0x78] sm:$0xff] %v1500_v14  ;;  %v1579_v57 = vmax.f32 %v1563_v51, 0.0  ;;  %v1580_v59 = vmax.f32 %v1564_v53, 0.0 }
 0x2bd   : > { %1582 = vst [vmem:[%s2701_s19 + $0x80] sm:$0xff] %v1566_v19  ;;  %v1581_v60 = vmax.f32 %v1565_v55, 0.0 }
 0x2be   : > { %1583 = vst [vmem:[%s2701_s19 + $0x88] sm:$0xff] %v1567_v23 }
 0x2bf   : > { %1584 = vst [vmem:[%s2701_s19 + $0x90] sm:$0xff] %v1568_v26 }
 0x2c0   : > { %1585 = vst [vmem:[%s2701_s19 + $0x98] sm:$0xff] %v1569_v30 }
 0x2c1   : > { %1586 = vst [vmem:[%s2701_s19 + $0xa0] sm:$0xff] %v1570_v34 }
 0x2c2   : > { %1587 = vst [vmem:[%s2701_s19 + $0xa8] sm:$0xff] %v1571_v38 }
 0x2c3   : > { %1588 = vst [vmem:[%s2701_s19 + $0xb0] sm:$0xff] %v1572_v43 }
 0x2c4   : > { %1589 = vst [vmem:[%s2701_s19 + $0xb8] sm:$0xff] %v1573_v46 }
 0x2c5   : > { %1590 = vst [vmem:[%s2701_s19 + $0xc0] sm:$0xff] %v1574_v49 }
 0x2c6   : > { %1591 = vst [vmem:[%s2701_s19 + $0xc8] sm:$0xff] %v1575_v52 }
 0x2c7   : > { %1592 = vst [vmem:[%s2701_s19 + $0xd0] sm:$0xff] %v1576_v54 }
 0x2c8   : > { %1593 = vst [vmem:[%s2701_s19 + $0xd8] sm:$0xff] %v1577_v56 }
 0x2c9   : > { %1594 = vst [vmem:[%s2701_s19 + $0xe0] sm:$0xff] %v1578_v58 }
 0x2ca   : > { %1595 = vst [vmem:[%s2701_s19 + $0xe8] sm:$0xff] %v1579_v57 }
 0x2cb   : > { %1596 = vst [vmem:[%s2701_s19 + $0xf0] sm:$0xff] %v1580_v59 }
 0x2cc   : > { %1597 = vst [vmem:[%s2701_s19 + $0xf8] sm:$0xff] %v1581_v60 }
 0x2cd PF: > { %s12_s15 = sadd.s32 1, %s2386_s15   ;;  %s3127_s9 = smov %s2366_s10 }
 0x2ce   : > { %p9_p13 = scmp.ge.s32.totalorder %s12_s15, 6   ;;  %s3128_s10 = smov %s2456_s22 }
 0x2cf   : > { %s3129_s11 = smov %s2378_s13  ;;  %s3130_s12 = smov %s2382_s14 }
 0x2d0   : > { %s3131_s13 = smov %s3134_s16  ;;  %s3132_s14 = smov %s3138_s17 }
 0x2d1   :  { %11 = sbr.rel (!%p9_p13) target bundleno = 4 (0x4), region = 96 }

</bundles_post_ra>
